<compile_context>
chip_gen: v7x
topology: tpu7x:2x2x1
jax: 0.10.0
libtpu: 0.0.40
codegen_flags: <defaults>
</compile_context>

<pallas_src>
import functools

import jax
import jax.numpy as jnp
from jax.experimental import pallas as pl
from jax.experimental.pallas import tpu as pltpu


def _round_up(x, m):
    return ((x + m - 1) // m) * m


def _vmem_capacity_bytes():
    try:
        return int(pltpu.get_tpu_info().vmem_capacity_bytes)
    except Exception:
        return 64 << 20  # conservative default (v7x per-TensorCore VMEM)


# ---------------------------------------------------------------------------
# Fused kernel:  L x [ relu(BN(norm * (A @ (norm * h)))) ]  ->  Linear(+BN) -> Linear
# ---------------------------------------------------------------------------
def fused_gcn_mlp_kernel(a_ref, h_ref, bn_scale_ref, bn_shift_ref,
                         w1_ref, b1_ref, w2_ref, b2_ref, out_ref, *, n_layers):
    a = a_ref[...]                                   # (n_pad, n_pad) bf16, resident once
    h = h_ref[...]                                   # (n_pad, d_pad) f32

    # In-degrees from the resident adjacency (padded rows -> deg 0 -> clamp to 1).
    # A entries are exactly {0, 1} so the bf16 operand + f32 accumulation is exact.
    deg = jnp.sum(a.astype(jnp.float32), axis=1, keepdims=True)       # (n_pad, 1)
    norm = jax.lax.rsqrt(jnp.maximum(deg, 1.0))                       # D^-1/2, EUP

    # Keep BN scale/shift as (1, d_pad); the fused multiply broadcasts them
    # (no materialised (n_pad, d_pad) VMEM copies).
    bn_scale = bn_scale_ref[...]
    bn_shift = bn_shift_ref[...]

    # NOTE: padded rows of h become relu(bn_shift) after a layer; they never
    # contaminate real rows only because the padded *columns* of A are zero.
    for _ in range(n_layers):
        hn = (h * norm).astype(jnp.bfloat16)                          # pre-norm, VPU
        agg = jnp.dot(a, hn, preferred_element_type=jnp.float32)      # MXU, bf16 x bf16
        h = jnp.maximum(agg * norm * bn_scale + bn_shift, 0.0)        # post-norm+BN+ReLU

    # MLP head (BN already folded into w1/b1 in the wrapper): Linear -> Linear.
    y = jnp.dot(h.astype(jnp.bfloat16), w1_ref[...],
                preferred_element_type=jnp.float32) + b1_ref[...]
    out_ref[...] = jnp.dot(y.astype(jnp.bfloat16), w2_ref[...],
                           preferred_element_type=jnp.float32) + b2_ref[...]


# ---------------------------------------------------------------------------
# Wrapper: BN folding, lane/MXU padding, VMEM budgeting.
# ---------------------------------------------------------------------------
def _fold_bn(gamma, beta, mean, var, eps=1e-5):
    scale = gamma / jnp.sqrt(var + eps)
    shift = beta - mean * scale
    return scale, shift


def _pad2(x, rows, cols, dtype=jnp.float32):
    # Single fused cast+pad pass (no separate normalize / copy passes over A).
    x = jnp.asarray(x, dtype)
    return jnp.pad(x, ((0, rows - x.shape[0]), (0, cols - x.shape[1])))


def activation_gcn_forward(adj, h, params, *, n_layers):
    N, in_dim = h.shape
    hid = params["w1"].shape[1]
    n_classes = params["w2"].shape[1]

    assert adj.shape == (N, N), adj.shape
    assert params["w1"].shape[0] == in_dim
    # The per-layer BatchNorm1d(hid_dim) is applied to in_dim-wide aggregated
    # features in layer 0; the module construction (hiddim = indim) guarantees this.
    assert params["bn_gamma"].shape[0] == in_dim, "requires hid_dim == in_dim"

    n_pad = _round_up(N, 256)                    # MXU tile (v6e/v7x); x128 for v5e
    d_pad = _round_up(max(in_dim, hid), 128)     # lane-dense feature dim
    c_pad = _round_up(n_classes, 128)            # lane-dense output dim

    # in_feat_dropout: identity in eval mode.

    # Fold eval-mode BatchNorm running stats.
    bn_scale, bn_shift = _fold_bn(params["bn_gamma"], params["bn_beta"],
                                  params["bn_mean"], params["bn_var"])
    mlp_scale, mlp_shift = _fold_bn(params["mlp_bn_gamma"], params["mlp_bn_beta"],
                                    params["mlp_bn_mean"], params["mlp_bn_var"])
    # Fold the head BN (and its interaction with b1) directly into w1/b1.
    w1_folded = params["w1"] * mlp_scale[None, :]
    b1_folded = params["b1"] * mlp_scale + mlp_shift

    # Zero padding: padded feature lanes and padded A rows/cols stay zero, so the
    # real rows/cols of the result are untouched; padded rows are sliced off.
    args = (
        _pad2(adj, n_pad, n_pad, jnp.bfloat16),              # raw {0,1} adjacency
        _pad2(h, n_pad, d_pad, jnp.float32),
        _pad2(bn_scale[None, :], 1, d_pad, jnp.float32),
        _pad2(bn_shift[None, :], 1, d_pad, jnp.float32),
        _pad2(w1_folded, d_pad, d_pad, jnp.bfloat16),
        _pad2(b1_folded[None, :], 1, d_pad, jnp.float32),
        _pad2(params["w2"], d_pad, c_pad, jnp.bfloat16),
        _pad2(params["b2"][None, :], 1, c_pad, jnp.float32),
    )

    # --- VMEM budgeting / fully-resident guard -----------------------------
    resident_bytes = sum(int(x.size) * x.dtype.itemsize for x in args)
    resident_bytes += n_pad * c_pad * 4                      # output buffer
    headroom = 4 << 20
    vmem_cap = _vmem_capacity_bytes()
    if resident_bytes + headroom > vmem_cap:
        # TODO(synk): switch to a tiled (dst x src) reduction grid for graphs
        # exceeding VMEM (notably v7x's 64 MiB per-TensorCore budget).
        raise ValueError(
            f"graph too large for fully-resident kernel: need "
            f"{resident_bytes + headroom} B, VMEM capacity {vmem_cap} B")
    vmem_limit = max(16 << 20,
                     min(2 * resident_bytes + headroom, int(vmem_cap * 0.9)))

    vmem_spec = lambda: pl.BlockSpec(memory_space=pltpu.MemorySpace.VMEM)
    out_padded = pl.pallas_call(
        functools.partial(fused_gcn_mlp_kernel, n_layers=n_layers),
        out_shape=jax.ShapeDtypeStruct((n_pad, c_pad), jnp.float32),
        in_specs=[vmem_spec() for _ in args],
        out_specs=vmem_spec(),
        compiler_params=pltpu.CompilerParams(vmem_limit_bytes=int(vmem_limit)),
    )(*args)

    return out_padded[:N, :n_classes]


# ---------------------------------------------------------------------------
# Pure-JAX f32 reference (for correctness checking)
# ---------------------------------------------------------------------------
def _reference_forward(adj, h, params, *, n_layers):
    hi = jax.lax.Precision.HIGHEST
    deg = jnp.maximum(jnp.sum(adj, axis=1), 1.0)
    norm = (deg ** -0.5)[:, None]
    bn_s, bn_t = _fold_bn(params["bn_gamma"], params["bn_beta"],
                          params["bn_mean"], params["bn_var"])
    for _ in range(n_layers):
        h = h * norm
        h = jnp.dot(adj, h, precision=hi)
        h = h * norm
        h = h * bn_s[None, :] + bn_t[None, :]
        h = jnp.maximum(h, 0.0)
    s, t = _fold_bn(params["mlp_bn_gamma"], params["mlp_bn_beta"],
                    params["mlp_bn_mean"], params["mlp_bn_var"])
    y = jnp.dot(h, params["w1"], precision=hi) + params["b1"]
    y = y * s[None, :] + t[None, :]
    return jnp.dot(y, params["w2"], precision=hi) + params["b2"]


# ---------------------------------------------------------------------------
# Deterministic parameter init (PyTorch-style defaults, nontrivial BN stats)
# ---------------------------------------------------------------------------
def init_params(key, in_dim, hid_dim, n_classes):
    ks = jax.random.split(key, 12)
    b1 = 1.0 / jnp.sqrt(in_dim)
    b2 = 1.0 / jnp.sqrt(hid_dim)
    u = lambda k, s, lo, hi: jax.random.uniform(k, s, jnp.float32, lo, hi)
    return {
        # batchnorm_h (nontrivial running stats to exercise the folding)
        "bn_gamma": u(ks[0], (hid_dim,), 0.5, 1.5),
        "bn_beta": u(ks[1], (hid_dim,), -0.1, 0.1),
        "bn_mean": u(ks[2], (hid_dim,), -0.1, 0.1),
        "bn_var": u(ks[3], (hid_dim,), 0.5, 1.5),
        # MLP head: Linear(in, hid) -> BN(hid) -> Linear(hid, n_classes)
        "w1": u(ks[4], (in_dim, hid_dim), -b1, b1),
        "b1": u(ks[5], (hid_dim,), -b1, b1),
        "mlp_bn_gamma": u(ks[6], (hid_dim,), 0.5, 1.5),
        "mlp_bn_beta": u(ks[7], (hid_dim,), -0.1, 0.1),
        "mlp_bn_mean": u(ks[8], (hid_dim,), -0.1, 0.1),
        "mlp_bn_var": u(ks[9], (hid_dim,), 0.5, 1.5),
        "w2": u(ks[10], (hid_dim, n_classes), -b2, b2),
        "b2": u(ks[11], (n_classes,), -b2, b2),
    }


if __name__ == "__main__":
    # Small synthetic citation-style graph: N nodes, in_dim features, L GCN layers.
    N, IN_DIM, N_CLASSES, L = 64, 32, 8, 2

    key = jax.random.PRNGKey(0)
    k_adj, k_h, k_params = jax.random.split(key, 3)

    # adj[v, u] = 1 iff edge u -> v (dst, src), so (A @ h)[v] sums features of v's
    # in-neighbours (DGL in-edge aggregation) and row sums are in-degrees.
    adj = (jax.random.uniform(k_adj, (N, N)) < 0.1).astype(jnp.float32)
    h = jax.random.normal(k_h, (N, IN_DIM), jnp.float32)
    params = init_params(k_params, IN_DIM, IN_DIM, N_CLASSES)

    fwd = jax.jit(functools.partial(activation_gcn_forward, n_layers=L))
    out = jax.block_until_ready(fwd(adj, h, params))

    assert out.shape == (N, N_CLASSES), out.shape
    assert bool(jnp.all(jnp.isfinite(out)))

    ref = _reference_forward(adj, h, params, n_layers=L)
    max_err = float(jnp.max(jnp.abs(out - ref)))
    assert bool(jnp.allclose(out, ref, atol=5e-2, rtol=5e-2)), max_err

    print("KERNEL_OK")
</pallas_src>

<mosaic_0001>
module attributes {stable_mosaic.version = 11 : i64} {
  func.func @fused_gcn_mlp_kernel(%arg0: memref<256x256xbf16, #tpu.memory_space<vmem>>, %arg1: memref<256x128xf32, #tpu.memory_space<vmem>>, %arg2: memref<1x128xf32, #tpu.memory_space<vmem>>, %arg3: memref<1x128xf32, #tpu.memory_space<vmem>>, %arg4: memref<128x128xbf16, #tpu.memory_space<vmem>>, %arg5: memref<1x128xf32, #tpu.memory_space<vmem>>, %arg6: memref<128x128xbf16, #tpu.memory_space<vmem>>, %arg7: memref<1x128xf32, #tpu.memory_space<vmem>>, %arg8: memref<256x128xf32, #tpu.memory_space<vmem>>) attributes {dimension_semantics = [], scalar_prefetch = 0 : i64, scratch_operands = 0 : i64, tpu.core_type = #tpu.core_type<tc>} {
    %c0 = arith.constant 0 : index
    %c0_0 = arith.constant 0 : index
    %0 = vector.load %arg0[%c0, %c0_0] : memref<256x256xbf16, #tpu.memory_space<vmem>>, vector<256x256xbf16>
    %c0_1 = arith.constant 0 : index
    %c0_2 = arith.constant 0 : index
    %1 = vector.load %arg1[%c0_1, %c0_2] : memref<256x128xf32, #tpu.memory_space<vmem>>, vector<256x128xf32>
    %2 = arith.extf %0 : vector<256x256xbf16> to vector<256x256xf32>
    %cst = arith.constant dense<0.000000e+00> : vector<256xf32>
    %3 = vector.multi_reduction <add>, %2, %cst [1] : vector<256x256xf32> to vector<256xf32>
    %4 = vector.shape_cast %3 : vector<256xf32> to vector<256x1xf32>
    %cst_3 = arith.constant 1.000000e+00 : f32
    %5 = vector.broadcast %cst_3 : f32 to vector<256x1xf32>
    %6 = arith.maximumf %4, %5 : vector<256x1xf32>
    %7 = math.rsqrt %6 : vector<256x1xf32>
    %c0_4 = arith.constant 0 : index
    %c0_5 = arith.constant 0 : index
    %8 = vector.load %arg2[%c0_4, %c0_5] : memref<1x128xf32, #tpu.memory_space<vmem>>, vector<1x128xf32>
    %c0_6 = arith.constant 0 : index
    %c0_7 = arith.constant 0 : index
    %9 = vector.load %arg3[%c0_6, %c0_7] : memref<1x128xf32, #tpu.memory_space<vmem>>, vector<1x128xf32>
    %10 = vector.broadcast %7 : vector<256x1xf32> to vector<256x128xf32>
    %11 = arith.mulf %1, %10 : vector<256x128xf32>
    %12 = arith.truncf %11 : vector<256x128xf32> to vector<256x128xbf16>
    %cst_8 = arith.constant dense<0.000000e+00> : vector<256x128xf32>
    %13 = tpu.matmul %0, %12, %cst_8 {dimension_numbers = #tpu.dot_dimension_numbers<[1], [0], [0], [1], [0, 0, 1, 1], [], []>} : vector<256x256xbf16>, vector<256x128xbf16>, vector<256x128xf32> -> vector<256x128xf32>
    %14 = vector.broadcast %7 : vector<256x1xf32> to vector<256x128xf32>
    %15 = arith.mulf %13, %14 : vector<256x128xf32>
    %16 = vector.broadcast %8 : vector<1x128xf32> to vector<256x128xf32>
    %17 = arith.mulf %15, %16 : vector<256x128xf32>
    %18 = vector.broadcast %9 : vector<1x128xf32> to vector<256x128xf32>
    %19 = arith.addf %17, %18 : vector<256x128xf32>
    %cst_9 = arith.constant 0.000000e+00 : f32
    %20 = vector.broadcast %cst_9 : f32 to vector<256x128xf32>
    %21 = arith.maximumf %19, %20 : vector<256x128xf32>
    %22 = vector.broadcast %7 : vector<256x1xf32> to vector<256x128xf32>
    %23 = arith.mulf %21, %22 : vector<256x128xf32>
    %24 = arith.truncf %23 : vector<256x128xf32> to vector<256x128xbf16>
    %cst_10 = arith.constant dense<0.000000e+00> : vector<256x128xf32>
    %25 = tpu.matmul %0, %24, %cst_10 {dimension_numbers = #tpu.dot_dimension_numbers<[1], [0], [0], [1], [0, 0, 1, 1], [], []>} : vector<256x256xbf16>, vector<256x128xbf16>, vector<256x128xf32> -> vector<256x128xf32>
    %26 = vector.broadcast %7 : vector<256x1xf32> to vector<256x128xf32>
    %27 = arith.mulf %25, %26 : vector<256x128xf32>
    %28 = vector.broadcast %8 : vector<1x128xf32> to vector<256x128xf32>
    %29 = arith.mulf %27, %28 : vector<256x128xf32>
    %30 = vector.broadcast %9 : vector<1x128xf32> to vector<256x128xf32>
    %31 = arith.addf %29, %30 : vector<256x128xf32>
    %cst_11 = arith.constant 0.000000e+00 : f32
    %32 = vector.broadcast %cst_11 : f32 to vector<256x128xf32>
    %33 = arith.maximumf %31, %32 : vector<256x128xf32>
    %34 = arith.truncf %33 : vector<256x128xf32> to vector<256x128xbf16>
    %c0_12 = arith.constant 0 : index
    %c0_13 = arith.constant 0 : index
    %35 = vector.load %arg4[%c0_12, %c0_13] : memref<128x128xbf16, #tpu.memory_space<vmem>>, vector<128x128xbf16>
    %cst_14 = arith.constant dense<0.000000e+00> : vector<256x128xf32>
    %36 = tpu.matmul %34, %35, %cst_14 {dimension_numbers = #tpu.dot_dimension_numbers<[1], [0], [0], [1], [0, 0, 1, 1], [], []>} : vector<256x128xbf16>, vector<128x128xbf16>, vector<256x128xf32> -> vector<256x128xf32>
    %c0_15 = arith.constant 0 : index
    %c0_16 = arith.constant 0 : index
    %37 = vector.load %arg5[%c0_15, %c0_16] : memref<1x128xf32, #tpu.memory_space<vmem>>, vector<1x128xf32>
    %38 = vector.broadcast %37 : vector<1x128xf32> to vector<256x128xf32>
    %39 = arith.addf %36, %38 : vector<256x128xf32>
    %40 = arith.truncf %39 : vector<256x128xf32> to vector<256x128xbf16>
    %c0_17 = arith.constant 0 : index
    %c0_18 = arith.constant 0 : index
    %41 = vector.load %arg6[%c0_17, %c0_18] : memref<128x128xbf16, #tpu.memory_space<vmem>>, vector<128x128xbf16>
    %cst_19 = arith.constant dense<0.000000e+00> : vector<256x128xf32>
    %42 = tpu.matmul %40, %41, %cst_19 {dimension_numbers = #tpu.dot_dimension_numbers<[1], [0], [0], [1], [0, 0, 1, 1], [], []>} : vector<256x128xbf16>, vector<128x128xbf16>, vector<256x128xf32> -> vector<256x128xf32>
    %c0_20 = arith.constant 0 : index
    %c0_21 = arith.constant 0 : index
    %43 = vector.load %arg7[%c0_20, %c0_21] : memref<1x128xf32, #tpu.memory_space<vmem>>, vector<1x128xf32>
    %44 = vector.broadcast %43 : vector<1x128xf32> to vector<256x128xf32>
    %45 = arith.addf %42, %44 : vector<256x128xf32>
    %c0_22 = arith.constant 0 : index
    %c0_23 = arith.constant 0 : index
    %46 = vector.load %arg8[%c0_22, %c0_23] : memref<256x128xf32, #tpu.memory_space<vmem>>, vector<256x128xf32>
    tpu.vector_store %arg8[%c0_22, %c0_23], %45 {strides = array<i32>} : memref<256x128xf32, #tpu.memory_space<vmem>>, vector<256x128xf32>,
    return
  }
}

</mosaic_0001>

<bundles_post_ra>
// kernel: activation_gcn_forward.1
= control target key start
LH: loop header
LB: loop body
LE: loop exit
PB: predicated region body
PF: predicated region fallthrough
CT: control target
= control target key end

     0   :  { %s3415_s0 = inlined_call_operand.vmem [shape: bf16[256,256], index: 0, kind: input, shape index: {}]   ;;  %s3416_s1 = inlined_call_operand.vmem [shape: f32[256,128], index: 1, kind: input, shape index: {}]   ;;  %s3417_s2 = inlined_call_operand.vmem [shape: f32[1,128], index: 2, kind: input, shape index: {}]   ;;  %s3418_s3 = inlined_call_operand.vmem [shape: f32[1,128], index: 3, kind: input, shape index: {}]   ;;  %s3419_s4 = inlined_call_operand.vmem [shape: bf16[128,128], index: 4, kind: input, shape index: {}]   ;;  %s3420_s6 = inlined_call_operand.vmem [shape: bf16[128,128], index: 6, kind: input, shape index: {}]   ;;  %s3421_s5 = inlined_call_operand.vmem [shape: f32[1,128], index: 5, kind: input, shape index: {}]   ;;  %s3422_s7 = inlined_call_operand.vmem [shape: f32[1,128], index: 7, kind: input, shape index: {}]   ;;  %s3423_s8 = inlined_call_operand.vmem [shape: f32[256,128], index: 8, kind: output, shape index: {}]  }
   0x1   :  { %v2280_v0 = vld [vmem:[%s3415_s0 + $0x80] sm:$0xff]  ;;  %v2290_v2 = vld [vmem:[%s3415_s0 + $0x88] sm:$0xff]  ;;  %v2304_v8 = vld [vmem:[%s3415_s0 + $0x90] sm:$0xff] }
   0x2   :  { %v2285_v1 = vld [vmem:[%s3415_s0] sm:$0xff]  ;;  %v126_v3 = vunpack.c.l.bf16 %v2280_v0  ;;  %v127_v4 = vunpack.c.h.bf16 %v2280_v0  ;;  %v2299_v7 = vld [vmem:[%s3415_s0 + $0x8] sm:$0xff]  ;;  %v128_v9 = vunpack.c.l.bf16 %v2290_v2  ;;  %v129_v10 = vunpack.c.h.bf16 %v2290_v2  ;;  %v2313_v13 = vld [vmem:[%s3415_s0 + $0x98] sm:$0xff] }
   0x3   :  { %v94_v5 = vunpack.c.l.bf16 %v2285_v1  ;;  %v95_v6 = vunpack.c.h.bf16 %v2285_v1  ;;  %v96_v11 = vunpack.c.l.bf16 %v2299_v7  ;;  %v97_v12 = vunpack.c.h.bf16 %v2299_v7  ;;  %v2322_v22 = vld [vmem:[%s3415_s0 + $0x10] sm:$0xff]  ;;  %v2327_v23 = vld [vmem:[%s3415_s0 + $0x18] sm:$0xff]  ;;  %v2336_v30 = vld [vmem:[%s3415_s0 + $0xa0] sm:$0xff] }
   0x4   :  { %v206_v14 = vadd.f32 %v127_v4, %v126_v3  ;;  %v130_v16 = vunpack.c.l.bf16 %v2304_v8  ;;  %v131_v17 = vunpack.c.h.bf16 %v2304_v8  ;;  %v209_v18 = vadd.f32 %v129_v10, %v128_v9  ;;  %v2341_v31 = vld [vmem:[%s3415_s0 + $0xa8] sm:$0xff]  ;;  %v2350_v38 = vld [vmem:[%s3415_s0 + $0x20] sm:$0xff]  ;;  %v2364_v46 = vld [vmem:[%s3415_s0 + $0xb0] sm:$0xff] }
   0x5   :  { %v158_v15 = vadd.f32 %v95_v6, %v94_v5  ;;  %v161_v19 = vadd.f32 %v97_v12, %v96_v11  ;;  %v132_v20 = vunpack.c.l.bf16 %v2313_v13  ;;  %v133_v21 = vunpack.c.h.bf16 %v2313_v13  ;;  %v2355_v39 = vld [vmem:[%s3415_s0 + $0x28] sm:$0xff]  ;;  %v2369_v47 = vld [vmem:[%s3415_s0 + $0xb8] sm:$0xff]  ;;  %v2378_v54 = vld [vmem:[%s3415_s0 + $0x30] sm:$0xff] }
   0x6   :  { %207 = vadd.xlane.f32.xlu0 %v206_v14  ;;  %v212_v24 = vadd.f32 %v131_v17, %v130_v16  ;;  %v98_v25 = vunpack.c.l.bf16 %v2322_v22  ;;  %v99_v27 = vunpack.c.h.bf16 %v2322_v22  ;;  %v100_v28 = vunpack.c.l.bf16 %v2327_v23  ;;  %v2383_v55 = vld [vmem:[%s3415_s0 + $0x38] sm:$0xff]  ;;  %v2392_v62 = vld [vmem:[%s3415_s0 + $0xc0] sm:$0xff]  ;;  %v2397_v63 = vld [vmem:[%s3415_s0 + $0xc8] sm:$0xff] }
   0x7   :  { %159 = vadd.xlane.f32.xlu1 %v158_v15  ;;  %v215_v26 = vadd.f32 %v133_v21, %v132_v20  ;;  %v101_v29 = vunpack.c.h.bf16 %v2327_v23  ;;  %v134_v32 = vunpack.c.l.bf16 %v2336_v30  ;;  %v135_v33 = vunpack.c.h.bf16 %v2336_v30  ;;  %v2406_v11 = vld [vmem:[%s3415_s0 + $0x40] sm:$0xff]  ;;  %v2411_v12 = vld [vmem:[%s3415_s0 + $0x48] sm:$0xff]  ;;  %v2420_v20 = vld [vmem:[%s3415_s0 + $0xd0] sm:$0xff] }
   0x8   :  { %v164_v34 = vadd.f32 %v99_v27, %v98_v25  ;;  %v136_v36 = vunpack.c.l.bf16 %v2341_v31  ;;  %v137_v37 = vunpack.c.h.bf16 %v2341_v31  ;;  %v102_v41 = vunpack.c.l.bf16 %v2350_v38  ;;  %v2425_v21 = vld [vmem:[%s3415_s0 + $0xd8] sm:$0xff] }
   0x9   :  { %v167_v35 = vadd.f32 %v101_v29, %v100_v28  ;;  %v218_v40 = vadd.f32 %v135_v33, %v134_v32  ;;  %v103_v43 = vunpack.c.h.bf16 %v2350_v38  ;;  %v104_v44 = vunpack.c.l.bf16 %v2355_v39  ;;  %v2434_v32 = vld [vmem:[%s3415_s0 + $0x50] sm:$0xff]  ;;  %v2439_v33 = vld [vmem:[%s3415_s0 + $0x58] sm:$0xff] }
   0xa   :  { %210 = vadd.xlane.f32.xlu0 %v209_v18  ;;  %v221_v42 = vadd.f32 %v137_v37, %v136_v36  ;;  %v105_v45 = vunpack.c.h.bf16 %v2355_v39  ;;  %v138_v48 = vunpack.c.l.bf16 %v2364_v46  ;;  %v139_v49 = vunpack.c.h.bf16 %v2364_v46 }
   0xb   :  { %162 = vadd.xlane.f32.xlu1 %v161_v19  ;;  %v170_v50 = vadd.f32 %v103_v43, %v102_v41  ;;  %v140_v52 = vunpack.c.l.bf16 %v2369_v47  ;;  %v141_v53 = vunpack.c.h.bf16 %v2369_v47  ;;  %v106_v57 = vunpack.c.l.bf16 %v2378_v54  ;;  %v2453_v43 = vld [vmem:[%s3415_s0 + $0xe8] sm:$0xff] }
   0xc   :  { %v173_v51 = vadd.f32 %v105_v45, %v104_v44  ;;  %v224_v56 = vadd.f32 %v139_v49, %v138_v48  ;;  %v107_v59 = vunpack.c.h.bf16 %v2378_v54  ;;  %v108_v60 = vunpack.c.l.bf16 %v2383_v55 }
   0xd   :  { %v227_v58 = vadd.f32 %v141_v53, %v140_v52  ;;  %v109_v61 = vunpack.c.h.bf16 %v2383_v55  ;;  %v142_v3 = vunpack.c.l.bf16 %v2392_v62  ;;  %v143_v4 = vunpack.c.h.bf16 %v2392_v62  ;;  %v2462_v52 = vld [vmem:[%s3415_s0 + $0x60] sm:$0xff]  ;;  %v2467_v53 = vld [vmem:[%s3415_s0 + $0x68] sm:$0xff] }
   0xe   :  { %213 = vadd.xlane.f32.xlu0 %v212_v24  ;;  %v176_v5 = vadd.f32 %v107_v59, %v106_v57  ;;  %v144_v9 = vunpack.c.l.bf16 %v2397_v63  ;;  %v145_v10 = vunpack.c.h.bf16 %v2397_v63  ;;  %v110_v15 = vunpack.c.l.bf16 %v2406_v11 }
   0xf   :  { %216 = vadd.xlane.f32.xlu1 %v215_v26  ;;  %v179_v6 = vadd.f32 %v109_v61, %v108_v60  ;;  %v230_v14 = vadd.f32 %v143_v4, %v142_v3  ;;  %v111_v17 = vunpack.c.h.bf16 %v2406_v11  ;;  %v112_v18 = vunpack.c.l.bf16 %v2411_v12  ;;  %v2476_v3 = vld [vmem:[%s3415_s0 + $0xf0] sm:$0xff]  ;;  %v2481_v4 = vld [vmem:[%s3415_s0 + $0xf8] sm:$0xff] }
  0x10   :  { %v233_v16 = vadd.f32 %v145_v10, %v144_v9  ;;  %v113_v19 = vunpack.c.h.bf16 %v2411_v12  ;;  %v146_v24 = vunpack.c.l.bf16 %v2420_v20  ;;  %v147_v25 = vunpack.c.h.bf16 %v2420_v20 }
  0x11   :  { %v182_v26 = vadd.f32 %v111_v17, %v110_v15  ;;  %v148_v28 = vunpack.c.l.bf16 %v2425_v21  ;;  %v149_v29 = vunpack.c.h.bf16 %v2425_v21  ;;  %v115_v37 = vunpack.c.h.bf16 %v2434_v32  ;;  %v2495_v17 = vld [vmem:[%s3415_s0 + $0x78] sm:$0xff] }
  0x12   :  { %165 = vadd.xlane.f32.xlu0 %v164_v34  ;;  %v185_v27 = vadd.f32 %v113_v19, %v112_v18  ;;  %v236_v34 = vadd.f32 %v147_v25, %v146_v24  ;;  %v117_v41 = vunpack.c.h.bf16 %v2439_v33  ;;  %v118_v57 = vunpack.c.l.bf16 %v2462_v52 }
  0x13   :  { %168 = vadd.xlane.f32.xlu1 %v167_v35  ;;  %v114_v35 = vunpack.c.l.bf16 %v2434_v32  ;;  %v239_v36 = vadd.f32 %v149_v29, %v148_v28  ;;  %v119_v59 = vunpack.c.h.bf16 %v2462_v52  ;;  %v120_v60 = vunpack.c.l.bf16 %v2467_v53 }
  0x14   :  { %v121_v61 = vunpack.c.h.bf16 %v2467_v53  ;;  %v157_v15 = vunpack.c.h.bf16 %v2481_v4 }
  0x15   :  { %v188_v48 = vadd.f32 %v115_v37, %v114_v35  ;;  %v194_v9 = vadd.f32 %v119_v59, %v118_v57 }
  0x16   :  { %219 = vadd.xlane.f32.xlu0 %v218_v40  ;;  %v116_v40 = vunpack.c.l.bf16 %v2439_v33  ;;  %v197_v10 = vadd.f32 %v121_v61, %v120_v60 }
  0x17   :  { %222 = vadd.xlane.f32.xlu1 %v221_v42  ;;  %v2448_v42 = vld [vmem:[%s3415_s0 + $0xe0] sm:$0xff] }
  0x18   :  { %v150_v44 = vunpack.c.l.bf16 %v2448_v42  ;;  %v151_v45 = vunpack.c.h.bf16 %v2448_v42  ;;  %v191_v49 = vadd.f32 %v117_v41, %v116_v40 }
  0x1a   :  { %171 = vadd.xlane.f32.xlu0 %v170_v50  ;;  %v152_v50 = vunpack.c.l.bf16 %v2453_v43 }
  0x1b   :  { %174 = vadd.xlane.f32.xlu1 %v173_v51  ;;  %v153_v51 = vunpack.c.h.bf16 %v2453_v43 }
  0x1e   :  { %225 = vadd.xlane.f32.xlu0 %v224_v56  ;;  %v242_v56 = vadd.f32 %v151_v45, %v150_v44 }
  0x1f   :  { %228 = vadd.xlane.f32.xlu1 %v227_v58  ;;  %v245_v58 = vadd.f32 %v153_v51, %v152_v50 }
  0x22   :  { %177 = vadd.xlane.f32.xlu0 %v176_v5  ;;  %v154_v5 = vunpack.c.l.bf16 %v2476_v3 }
  0x23   :  { %180 = vadd.xlane.f32.xlu1 %v179_v6  ;;  %v155_v6 = vunpack.c.h.bf16 %v2476_v3 }
  0x25   :  { %v248_v18 = vadd.f32 %v155_v6, %v154_v5  ;;  %v78_v5 = vld [vmem:[%s3416_s1 + $0x80] sm:$0xff]  ;;  %v79_v6 = vld [vmem:[%s3416_s1 + $0x88] sm:$0xff] }
  0x26   :  { %231 = vadd.xlane.f32.xlu0 %v230_v14  ;;  %v156_v14 = vunpack.c.l.bf16 %v2481_v4 }
  0x27   :  { %234 = vadd.xlane.f32.xlu1 %v233_v16  ;;  %v2490_v16 = vld [vmem:[%s3415_s0 + $0x70] sm:$0xff] }
  0x28   :  { %v122_v19 = vunpack.c.l.bf16 %v2490_v16  ;;  %v251_v24 = vadd.f32 %v157_v15, %v156_v14  ;;  %v123_v25 = vunpack.c.h.bf16 %v2490_v16  ;;  %v62_v15 = vld [vmem:[%s3416_s1] sm:$0xff] }
  0x2a   :  { %183 = vadd.xlane.f32.xlu0 %v182_v26  ;;  %v124_v26 = vunpack.c.l.bf16 %v2495_v17  ;;  %v200_v28 = vadd.f32 %v123_v25, %v122_v19 }
  0x2b   :  { %186 = vadd.xlane.f32.xlu1 %v185_v27  ;;  %v125_v27 = vunpack.c.h.bf16 %v2495_v17 }
  0x2d   :  { %v203_v29 = vadd.f32 %v125_v27, %v124_v26 }
  0x2e   :  { %237 = vadd.xlane.f32.xlu0 %v236_v34  ;;  %v1699_v34 = vcombine.high %v2285_v1, %v2299_v7 }
  0x2f   :  { %240 = vadd.xlane.f32.xlu1 %v239_v36 }
  0x30   :  { %560 = vmatprep.mubr.bf16.mxu0 %v1699_v34  ;;  %909 = vmatprep.mubr.bf16.mxu1 %v1699_v34 }
  0x32   :  { %189 = vadd.xlane.f32.xlu0 %v188_v48 }
  0x33   :  { %192 = vadd.xlane.f32.xlu1 %v191_v49 }
  0x36   :  { %243 = vadd.xlane.f32.xlu0 %v242_v56 }
  0x37   :  { %246 = vadd.xlane.f32.xlu1 %v245_v58 }
  0x3a   :  { %195 = vadd.xlane.f32.xlu0 %v194_v9 }
  0x3b   :  { %198 = vadd.xlane.f32.xlu1 %v197_v10 }
  0x3e   :  { %249 = vadd.xlane.f32.xlu0 %v248_v18  ;;  %v63_v18 = vld [vmem:[%s3416_s1 + $0x8] sm:$0xff] }
  0x3f   :  { %252 = vadd.xlane.f32.xlu1 %v251_v24 }
  0x42   :  { %201 = vadd.xlane.f32.xlu0 %v200_v28 }
  0x43   :  { %204 = vadd.xlane.f32.xlu1 %v203_v29 }
  0x93   :  { %v208_v35 = vpop.xlane.xlu0 %207 }
  0x94   :  { %v160_v36 = vpop.xlane.xlu1 %159  ;;  %v270_v37 = vmax.f32 %v208_v35, 1.0  ;;  %v80_v35 = vld [vmem:[%s3416_s1 + $0x90] sm:$0xff] }
  0x95   :  { %v254_v40 = vmax.f32 %v160_v36, 1.0 }
  0x96   :  { %2166 = vrsqrt.f32 %v270_v37 }
  0x97   :  { %v211_v41 = vpop.xlane.xlu0 %210  ;;  %2168 = vrsqrt.f32 %v254_v40 }
  0x98   :  { %v163_v44 = vpop.xlane.xlu1 %162  ;;  %v271_v45 = vmax.f32 %v211_v41, 1.0  ;;  %v81_v41 = vld [vmem:[%s3416_s1 + $0x98] sm:$0xff] }
  0x99   :  { %v255_v48 = vmax.f32 %v163_v44, 1.0 }
  0x9a   :  { %2170 = vrsqrt.f32 %v271_v45 }
  0x9b   :  { %2172 = vrsqrt.f32 %v255_v48  ;;  %v214_v49 = vpop.xlane.xlu0 %213 }
  0x9c   :  { %v217_v50 = vpop.xlane.xlu1 %216  ;;  %v272_v51 = vmax.f32 %v214_v49, 1.0 }
  0x9d   :  { %v273_v56 = vmax.f32 %v217_v50, 1.0 }
  0x9e   :  { %2174 = vrsqrt.f32 %v272_v51 }
  0x9f   :  { %2176 = vrsqrt.f32 %v273_v56  ;;  %v166_v57 = vpop.xlane.xlu0 %165 }
  0xa0   :  { %v169_v58 = vpop.xlane.xlu1 %168  ;;  %v256_v59 = vmax.f32 %v166_v57, 1.0  ;;  %v2503_v61 = vpop.eup %2166  ;;  %v64_v57 = vld [vmem:[%s3416_s1 + $0x10] sm:$0xff] }
  0xa1   :  { %v257_v60 = vmax.f32 %v169_v58, 1.0  ;;  %v2511_v9 = vpop.eup %2168  ;;  %v336_v27 = vmul.f32 %v2503_v61, %v78_v5 }
  0xa2   :  { %2178 = vrsqrt.f32 %v256_v59  ;;  %3470 = vst [vmem:[#allocation2_spill] sm:$0xff] %v2511_v9  ;;  %v320_v29 = vmul.f32 %v2511_v9, %v62_v15 }
  0xa3   :  { %2180 = vrsqrt.f32 %v257_v60  ;;  %v220_v10 = vpop.xlane.xlu0 %219  ;;  %v65_v60 = vld [vmem:[%s3416_s1 + $0x18] sm:$0xff] }
  0xa4   :  { %v223_v14 = vpop.xlane.xlu1 %222  ;;  %v2519_v19 = vpop.eup %2170  ;;  %v274_v24 = vmax.f32 %v220_v10, 1.0 }
  0xa5   :  { %3471 = vst [vmem:[#allocation3_spill] sm:$0xff] %v2519_v19  ;;  %v275_v25 = vmax.f32 %v223_v14, 1.0  ;;  %v2521_v26 = vpop.eup %2172  ;;  %v337_v28 = vmul.f32 %v2519_v19, %v79_v6 }
  0xa6   :  { %3472 = vst [vmem:[#allocation4_spill] sm:$0xff] %v2521_v26  ;;  %2182 = vrsqrt.f32 %v274_v24  ;;  %v321_v34 = vmul.f32 %v2521_v26, %v63_v18 }
  0xa7   :  { %2184 = vrsqrt.f32 %v275_v25  ;;  %v172_v36 = vpop.xlane.xlu0 %171  ;;  %v360_v40 = vpack.c.bf16 %v337_v28, %v336_v27  ;;  %v82_v25 = vld [vmem:[%s3416_s1 + $0xa0] sm:$0xff] }
  0xa8   :  { %v175_v37 = vpop.xlane.xlu1 %174  ;;  %v2533_v44 = vpop.eup %2174  ;;  %v258_v45 = vmax.f32 %v172_v36, 1.0  ;;  %v352_v49 = vpack.c.bf16 %v321_v34, %v320_v29  ;;  %v83_v29 = vld [vmem:[%s3416_s1 + $0xa8] sm:$0xff] }
  0xa9   :  { %v259_v48 = vmax.f32 %v175_v37, 1.0  ;;  %v2535_v50 = vpop.eup %2176  ;;  %1750 = vmatprep.subr.bf16.mxu0 %v360_v40  ;;  %v338_v51 = vmul.f32 %v2533_v44, %v80_v35 }
  0xaa   :  { %2186 = vrsqrt.f32 %v258_v45  ;;  %1751 = vmatpush3.bf16.msra.mxu0 %v352_v49  ;;  %v339_v56 = vmul.f32 %v2535_v50, %v81_v41 }
  0xab   :  { %2188 = vrsqrt.f32 %v259_v48  ;;  %v226_v58 = vpop.xlane.xlu0 %225  ;;  %v66_v48 = vld [vmem:[%s3416_s1 + $0x20] sm:$0xff] }
  0xac   :  { %v229_v59 = vpop.xlane.xlu1 %228  ;;  %v2545_v5 = vpop.eup %2178  ;;  %v276_v6 = vmax.f32 %v226_v58, 1.0  ;;  %v361_v14 = vpack.c.bf16 %v339_v56, %v338_v51  ;;  %v67_v56 = vld [vmem:[%s3416_s1 + $0x28] sm:$0xff] }
  0xad   :  { %3473 = vst [vmem:[#allocation5_spill] sm:$0xff] %v2545_v5  ;;  %v277_v10 = vmax.f32 %v229_v59, 1.0  ;;  %v2547_v15 = vpop.eup %2180  ;;  %v322_v18 = vmul.f32 %v2545_v5, %v64_v57 }
  0xae   :  { %3474 = vst [vmem:[#allocation6_spill] sm:$0xff] %v2547_v15  ;;  %2190 = vrsqrt.f32 %v276_v6  ;;  %1752 = vmatprep.subr.bf16.mxu0 %v361_v14  ;;  %v323_v24 = vmul.f32 %v2547_v15, %v65_v60 }
  0xaf   :  { %2192 = vrsqrt.f32 %v277_v10  ;;  %v178_v27 = vpop.xlane.xlu0 %177 }
  0xb0   :  { %v181_v28 = vpop.xlane.xlu1 %180  ;;  %v2557_v34 = vpop.eup %2182  ;;  %v260_v35 = vmax.f32 %v178_v27, 1.0  ;;  %v353_v37 = vpack.c.bf16 %v323_v24, %v322_v18  ;;  %v84_v18 = vld [vmem:[%s3416_s1 + $0xb0] sm:$0xff]  ;;  %v85_v27 = vld [vmem:[%s3416_s1 + $0xb8] sm:$0xff] }
  0xb1   :  { %3475 = vst [vmem:[#allocation7_spill] sm:$0xff] %v2557_v34  ;;  %v261_v36 = vmax.f32 %v181_v28, 1.0  ;;  %v2559_v40 = vpop.eup %2184  ;;  %v340_v41 = vmul.f32 %v2557_v34, %v82_v25 }
  0xb2   :  { %3476 = vst [vmem:[#allocation8_spill] sm:$0xff] %v2559_v40  ;;  %2194 = vrsqrt.f32 %v260_v35  ;;  %1753 = vmatpush3.bf16.msra.mxu0 %v353_v37  ;;  %v341_v45 = vmul.f32 %v2559_v40, %v83_v29  ;;  %v75_v40 = vld [vmem:[%s3416_s1 + $0x68] sm:$0xff] }
  0xb3   :  { %2196 = vrsqrt.f32 %v261_v36  ;;  %v232_v49 = vpop.xlane.xlu0 %231 }
  0xb4   :  { %v235_v51 = vpop.xlane.xlu1 %234  ;;  %v2569_v57 = vpop.eup %2186  ;;  %v278_v58 = vmax.f32 %v232_v49, 1.0  ;;  %v362_v60 = vpack.c.bf16 %v341_v45, %v340_v41 }
  0xb5   :  { %3477 = vst [vmem:[#allocation9_spill] sm:$0xff] %v2569_v57  ;;  %v279_v59 = vmax.f32 %v235_v51, 1.0  ;;  %v2571_v6 = vpop.eup %2188  ;;  %v324_v10 = vmul.f32 %v2569_v57, %v66_v48  ;;  %v68_v48 = vld [vmem:[%s3416_s1 + $0x30] sm:$0xff] }
  0xb6   :  { %3478 = vst [vmem:[#allocation10_spill] sm:$0xff] %v2571_v6  ;;  %2198 = vrsqrt.f32 %v278_v58  ;;  %1754 = vmatprep.subr.bf16.mxu0 %v362_v60  ;;  %v325_v14 = vmul.f32 %v2571_v6, %v67_v56  ;;  %v69_v56 = vld [vmem:[%s3416_s1 + $0x38] sm:$0xff] }
  0xb7   :  { %2200 = vrsqrt.f32 %v279_v59  ;;  %v184_v24 = vpop.xlane.xlu0 %183 }
  0xb8   :  { %v187_v25 = vpop.xlane.xlu1 %186  ;;  %v2581_v28 = vpop.eup %2190  ;;  %v262_v29 = vmax.f32 %v184_v24, 1.0  ;;  %v354_v36 = vpack.c.bf16 %v325_v14, %v324_v10 }
  0xb9   :  { %3479 = vst [vmem:[#allocation11_spill] sm:$0xff] %v2581_v28  ;;  %v263_v35 = vmax.f32 %v187_v25, 1.0  ;;  %v2583_v37 = vpop.eup %2192  ;;  %v342_v41 = vmul.f32 %v2581_v28, %v84_v18  ;;  %v86_v25 = vld [vmem:[%s3416_s1 + $0xc0] sm:$0xff] }
  0xba   :  { %3480 = vst [vmem:[#allocation12_spill] sm:$0xff] %v2583_v37  ;;  %2202 = vrsqrt.f32 %v262_v29  ;;  %1755 = vmatpush3.bf16.msra.mxu0 %v354_v36  ;;  %v343_v45 = vmul.f32 %v2583_v37, %v85_v27 }
  0xbb   :  { %2204 = vrsqrt.f32 %v263_v35  ;;  %v238_v49 = vpop.xlane.xlu0 %237  ;;  %v87_v35 = vld [vmem:[%s3416_s1 + $0xc8] sm:$0xff] }
  0xbc   :  { %v241_v51 = vpop.xlane.xlu1 %240  ;;  %v2593_v58 = vpop.eup %2194  ;;  %v280_v59 = vmax.f32 %v238_v49, 1.0  ;;  %v363_v10 = vpack.c.bf16 %v343_v45, %v342_v41 }
  0xbd   :  { %3481 = vst [vmem:[#allocation13_spill] sm:$0xff] %v2593_v58  ;;  %v281_v60 = vmax.f32 %v241_v51, 1.0  ;;  %v2595_v14 = vpop.eup %2196  ;;  %v326_v18 = vmul.f32 %v2593_v58, %v68_v48 }
  0xbe   :  { %3482 = vst [vmem:[#allocation14_spill] sm:$0xff] %v2595_v14  ;;  %2206 = vrsqrt.f32 %v280_v59  ;;  %1756 = vmatprep.subr.bf16.mxu0 %v363_v10  ;;  %v327_v24 = vmul.f32 %v2595_v14, %v69_v56  ;;  %v70_v59 = vld [vmem:[%s3416_s1 + $0x40] sm:$0xff] }
  0xbf   :  { %2208 = vrsqrt.f32 %v281_v60  ;;  %v190_v27 = vpop.xlane.xlu0 %189 }
  0xc0   :  { %v193_v29 = vpop.xlane.xlu1 %192  ;;  %v2605_v36 = vpop.eup %2198  ;;  %v264_v41 = vmax.f32 %v190_v27, 1.0  ;;  %v355_v48 = vpack.c.bf16 %v327_v24, %v326_v18  ;;  %v71_v27 = vld [vmem:[%s3416_s1 + $0x48] sm:$0xff] }
  0xc1   :  { %3483 = vst [vmem:[#allocation15_spill] sm:$0xff] %v2605_v36  ;;  %v265_v45 = vmax.f32 %v193_v29, 1.0  ;;  %v2607_v49 = vpop.eup %2200  ;;  %v344_v51 = vmul.f32 %v2605_v36, %v86_v25 }
  0xc2   :  { %3484 = vst [vmem:[#allocation16_spill] sm:$0xff] %v2607_v49  ;;  %2210 = vrsqrt.f32 %v264_v41  ;;  %1757 = vmatpush3.bf16.msra.mxu0 %v355_v48  ;;  %v345_v56 = vmul.f32 %v2607_v49, %v87_v35 }
  0xc3   :  { %2212 = vrsqrt.f32 %v265_v45  ;;  %v244_v60 = vpop.xlane.xlu0 %243  ;;  %v88_v45 = vld [vmem:[%s3416_s1 + $0xd0] sm:$0xff] }
  0xc4   :  { %v247_v10 = vpop.xlane.xlu1 %246  ;;  %v2617_v18 = vpop.eup %2202  ;;  %v282_v24 = vmax.f32 %v244_v60, 1.0  ;;  %v364_v25 = vpack.c.bf16 %v345_v56, %v344_v51  ;;  %v89_v60 = vld [vmem:[%s3416_s1 + $0xd8] sm:$0xff] }
  0xc5   :  { %3485 = vst [vmem:[#allocation17_spill] sm:$0xff] %v2617_v18  ;;  %v283_v29 = vmax.f32 %v247_v10, 1.0  ;;  %v2619_v41 = vpop.eup %2204  ;;  %v328_v35 = vmul.f32 %v2617_v18, %v70_v59 }
  0xc6   :  { %3486 = vst [vmem:[#allocation18_spill] sm:$0xff] %v2619_v41  ;;  %2214 = vrsqrt.f32 %v282_v24  ;;  %1758 = vmatprep.subr.bf16.mxu0 %v364_v25  ;;  %v329_v48 = vmul.f32 %v2619_v41, %v71_v27 }
  0xc7   :  { %2216 = vrsqrt.f32 %v283_v29  ;;  %v196_v49 = vpop.xlane.xlu0 %195  ;;  %v72_v29 = vld [vmem:[%s3416_s1 + $0x50] sm:$0xff] }
  0xc8   :  { %v199_v36 = vpop.xlane.xlu1 %198  ;;  %v2629_v51 = vpop.eup %2206  ;;  %v266_v56 = vmax.f32 %v196_v49, 1.0  ;;  %v356_v59 = vpack.c.bf16 %v329_v48, %v328_v35 }
  0xc9   :  { %3487 = vst [vmem:[#allocation19_spill] sm:$0xff] %v2629_v51  ;;  %v267_v10 = vmax.f32 %v199_v36, 1.0  ;;  %v2631_v24 = vpop.eup %2208  ;;  %v346_v27 = vmul.f32 %v2629_v51, %v88_v45  ;;  %v73_v36 = vld [vmem:[%s3416_s1 + $0x58] sm:$0xff] }
  0xca   :  { %3488 = vst [vmem:[#allocation20_spill] sm:$0xff] %v2631_v24  ;;  %2218 = vrsqrt.f32 %v266_v56  ;;  %1759 = vmatpush3.bf16.msra.mxu0 %v356_v59  ;;  %v347_v25 = vmul.f32 %v2631_v24, %v89_v60 }
  0xcb   :  { %2220 = vrsqrt.f32 %v267_v10  ;;  %v250_v37 = vpop.xlane.xlu0 %249  ;;  %v90_v10 = vld [vmem:[%s3416_s1 + $0xe0] sm:$0xff] }
  0xcc   :  { %v253_v28 = vpop.xlane.xlu1 %252  ;;  %v2641_v49 = vpop.eup %2210  ;;  %v284_v35 = vmax.f32 %v250_v37, 1.0  ;;  %v365_v45 = vpack.c.bf16 %v347_v25, %v346_v27 }
  0xcd   :  { %3489 = vst [vmem:[#allocation21_spill] sm:$0xff] %v2641_v49  ;;  %v285_v48 = vmax.f32 %v253_v28, 1.0  ;;  %v2643_v56 = vpop.eup %2212  ;;  %v330_v60 = vmul.f32 %v2641_v49, %v72_v29  ;;  %v91_v28 = vld [vmem:[%s3416_s1 + $0xe8] sm:$0xff] }
  0xce   :  { %3490 = vst [vmem:[#allocation22_spill] sm:$0xff] %v2643_v56  ;;  %2222 = vrsqrt.f32 %v284_v35  ;;  %1760 = vmatprep.subr.bf16.mxu0 %v365_v45  ;;  %v331_v59 = vmul.f32 %v2643_v56, %v73_v36 }
  0xcf   :  { %2224 = vrsqrt.f32 %v285_v48  ;;  %v202_v24 = vpop.xlane.xlu0 %201  ;;  %v74_v48 = vld [vmem:[%s3416_s1 + $0x60] sm:$0xff] }
  0xd0   :  { %v205_v51 = vpop.xlane.xlu1 %204  ;;  %v2653_v37 = vpop.eup %2214  ;;  %v268_v27 = vmax.f32 %v202_v24, 1.0  ;;  %v357_v29 = vpack.c.bf16 %v331_v59, %v330_v60 }
  0xd1   :  { %3491 = vst [vmem:[#allocation23_spill] sm:$0xff] %v2653_v37  ;;  %v269_v25 = vmax.f32 %v205_v51, 1.0  ;;  %v2655_v35 = vpop.eup %2216  ;;  %v348_v36 = vmul.f32 %v2653_v37, %v90_v10 }
  0xd2   :  { %3492 = vst [vmem:[#allocation24_spill] sm:$0xff] %v2655_v35  ;;  %2226 = vrsqrt.f32 %v268_v27  ;;  %1761 = vmatpush3.bf16.msra.mxu0 %v357_v29  ;;  %v349_v45 = vmul.f32 %v2655_v35, %v91_v28  ;;  %v92_v28 = vld [vmem:[%s3416_s1 + $0xf0] sm:$0xff]  ;;  %v93_v27 = vld [vmem:[%s3416_s1 + $0xf8] sm:$0xff] }
  0xd3   :  { %2228 = vrsqrt.f32 %v269_v25 }
  0xd4   :  { %v2665_v24 = vpop.eup %2218  ;;  %v366_v51 = vpack.c.bf16 %v349_v45, %v348_v36 }
  0xd5   :  { %3493 = vst [vmem:[#allocation25_spill] sm:$0xff] %v2665_v24  ;;  %v2667_v60 = vpop.eup %2220  ;;  %v332_v59 = vmul.f32 %v2665_v24, %v74_v48  ;;  %v77_v48 = vld [vmem:[%s3416_s1 + $0x78] sm:$0xff] }
  0xd6   :  { %3494 = vst [vmem:[#allocation26_spill] sm:$0xff] %v2667_v60  ;;  %1762 = vmatprep.subr.bf16.mxu0 %v366_v51  ;;  %v333_v10 = vmul.f32 %v2667_v60, %v75_v40  ;;  %v76_v40 = vld [vmem:[%s3416_s1 + $0x70] sm:$0xff] }
  0xd8   :  { %v2677_v25 = vpop.eup %2222  ;;  %v358_v29 = vpack.c.bf16 %v333_v10, %v332_v59 }
  0xd9   :  { %v2679_v35 = vpop.eup %2224  ;;  %v350_v36 = vmul.f32 %v2677_v25, %v92_v28 }
  0xda   :  { %1763 = vmatpush3.bf16.msra.mxu0 %v358_v29  ;;  %v351_v45 = vmul.f32 %v2679_v35, %v93_v27  ;;  %v2697_v27 = vcombine.low %v2285_v1, %v2299_v7  ;;  %v2701_v29 = vcombine.high %v2322_v22, %v2327_v23  ;;  %v2717_v1 = vcombine.low %v2350_v38, %v2355_v39 }
  0xdb   :  { %v2721_v7 = vcombine.high %v2378_v54, %v2383_v55 }
  0xdc   :  { %v2689_v51 = vpop.eup %2226  ;;  %v367_v37 = vpack.c.bf16 %v351_v45, %v350_v36  ;;  %v2707_v36 = vcombine.low %v2322_v22, %v2327_v23  ;;  %v2727_v22 = vcombine.low %v2378_v54, %v2383_v55  ;;  %v2731_v23 = vcombine.high %v2406_v11, %v2411_v12 }
  0xdd   :  { %3495 = vst [vmem:[#allocation27_spill] sm:$0xff] %v2689_v51  ;;  %v2691_v34 = vpop.eup %2228  ;;  %v334_v59 = vmul.f32 %v2689_v51, %v76_v40  ;;  %v2747_v54 = vcombine.low %v2434_v32, %v2439_v33  ;;  %v2751_v55 = vcombine.high %v2462_v52, %v2467_v53 }
  0xde   :  { %3496 = vst [vmem:[#allocation28_spill] sm:$0xff] %v2691_v34  ;;  %1764 = vmatprep.subr.bf16.mxu0 %v367_v37  ;;  %v335_v10 = vmul.f32 %v2691_v34, %v77_v48  ;;  %v2711_v37 = vcombine.high %v2350_v38, %v2355_v39  ;;  %v2737_v38 = vcombine.low %v2406_v11, %v2411_v12 }
  0xdf   :  { %v2741_v39 = vcombine.high %v2434_v32, %v2439_v33  ;;  %v2757_v11 = vcombine.low %v2462_v52, %v2467_v53  ;;  %v2761_v12 = vcombine.high %v2490_v16, %v2495_v17  ;;  %v2767_v32 = vcombine.low %v2490_v16, %v2495_v17 }
  0xe0   :  { %v359_v28 = vpack.c.bf16 %v335_v10, %v334_v59  ;;  %v2771_v33 = vcombine.high %v2280_v0, %v2290_v2  ;;  %v2777_v52 = vcombine.low %v2280_v0, %v2290_v2  ;;  %v2781_v53 = vcombine.high %v2304_v8, %v2313_v13 }
  0xe1   :  { %v2787_v16 = vcombine.low %v2304_v8, %v2313_v13  ;;  %v2791_v17 = vcombine.high %v2336_v30, %v2341_v31  ;;  %v2797_v0 = vcombine.low %v2336_v30, %v2341_v31  ;;  %v2801_v2 = vcombine.high %v2364_v46, %v2369_v47 }
  0xe2   :  { %1765 = vmatpush3.bf16.msra.mxu0 %v359_v28  ;;  %v2807_v8 = vcombine.low %v2364_v46, %v2369_v47  ;;  %v2811_v13 = vcombine.high %v2392_v62, %v2397_v63  ;;  %v2817_v30 = vcombine.low %v2392_v62, %v2397_v63  ;;  %v2821_v31 = vcombine.high %v2420_v20, %v2425_v21 }
  0xe3   :  { %v2827_v46 = vcombine.low %v2420_v20, %v2425_v21  ;;  %v2831_v47 = vcombine.high %v2448_v42, %v2453_v43  ;;  %v2837_v62 = vcombine.low %v2448_v42, %v2453_v43  ;;  %v2841_v63 = vcombine.high %v2476_v3, %v2481_v4  ;;  %v2853_v42 = vld [vmem:[%s3417_s2] ss:$0 sm:$0xff] }
  0xe4   :  { %3497 = vst [vmem:[#allocation29_spill] sm:$0xff] %v2807_v8  ;;  %3498 = vst [vmem:[#allocation30_spill] sm:$0xff] %v2811_v13  ;;  %v2847_v20 = vcombine.low %v2476_v3, %v2481_v4  ;;  %v2859_v3 = vld [vmem:[%s3418_s3] ss:$0 sm:$0xff] }
  0xe5   :  { %561 = vmatmul.mubr.bf16.vlgmr.msra.gmra.mrb[0].mxu0 %v2697_v27  ;;  %3499 = vst [vmem:[#allocation31_spill] sm:$0xff] %v2817_v30  ;;  %3500 = vst [vmem:[#allocation32_spill] sm:$0xff] %v2821_v31 }
  0xe6   :  { %568 = vmatprep.mubr.bf16.mxu0 %v2701_v29  ;;  %3501 = vst [vmem:[#allocation33_spill] sm:$0xff] %v2827_v46  ;;  %3502 = vst [vmem:[#allocation34_spill] sm:$0xff] %v2831_v47 }
  0xe7   :  { %3503 = vst [vmem:[#allocation35_spill] sm:$0xff] %v2837_v62  ;;  %3504 = vst [vmem:[#allocation36_spill] sm:$0xff] %v2841_v63 }
  0xe8   :  { %3505 = vst [vmem:[#allocation37_spill] sm:$0xff] %v2847_v20 }
  0xed   :  { %569 = vmatmul.mubr.bf16.gmra.mrb[4].mxu0 %v2707_v36 }
  0xee   :  { %576 = vmatprep.mubr.bf16.mxu0 %v2711_v37 }
  0xf5   :  { %577 = vmatmul.mubr.bf16.gmra.mrb[8].mxu0 %v2717_v1 }
  0xf6   :  { %584 = vmatprep.mubr.bf16.mxu0 %v2721_v7 }
  0xfd   :  { %585 = vmatmul.mubr.bf16.gmra.mrb[12].mxu0 %v2727_v22 }
  0xfe   :  { %592 = vmatprep.mubr.bf16.mxu0 %v2731_v23 }
 0x105   :  { %593 = vmatmul.mubr.bf16.gmra.mrb[16].mxu0 %v2737_v38 }
 0x106   :  { %600 = vmatprep.mubr.bf16.mxu0 %v2741_v39 }
 0x10d   :  { %601 = vmatmul.mubr.bf16.gmra.mrb[20].mxu0 %v2747_v54 }
 0x10e   :  { %608 = vmatprep.mubr.bf16.mxu0 %v2751_v55 }
 0x115   :  { %609 = vmatmul.mubr.bf16.gmra.mrb[24].mxu0 %v2757_v11 }
 0x116   :  { %616 = vmatprep.mubr.bf16.mxu0 %v2761_v12 }
 0x11d   :  { %617 = vmatmul.mubr.bf16.gmra.mrb[28].mxu0 %v2767_v32 }
 0x11e   :  { %624 = vmatprep.mubr.bf16.mxu0 %v2771_v33 }
 0x125   :  { %625 = vmatmul.mubr.bf16.gmra.mrb[32].mxu0 %v2777_v52 }
 0x126   :  { %632 = vmatprep.mubr.bf16.mxu0 %v2781_v53 }
 0x12d   :  { %633 = vmatmul.mubr.bf16.gmra.mrb[36].mxu0 %v2787_v16 }
 0x12e   :  { %640 = vmatprep.mubr.bf16.mxu0 %v2791_v17 }
 0x135   :  { %641 = vmatmul.mubr.bf16.gmra.mrb[40].mxu0 %v2797_v0 }
 0x136   :  { %648 = vmatprep.mubr.bf16.mxu0 %v2801_v2 }
 0x13d   :  { %649 = vmatmul.mubr.bf16.gmra.mrb[44].mxu0 %v2807_v8 }
 0x13e   :  { %656 = vmatprep.mubr.bf16.mxu0 %v2811_v13 }
 0x145   :  { %657 = vmatmul.mubr.bf16.gmra.mrb[48].mxu0 %v2817_v30 }
 0x146   :  { %664 = vmatprep.mubr.bf16.mxu0 %v2821_v31 }
 0x14d   :  { %665 = vmatmul.mubr.bf16.gmra.mrb[52].mxu0 %v2827_v46 }
 0x14e   :  { %672 = vmatprep.mubr.bf16.mxu0 %v2831_v47 }
 0x155   :  { %673 = vmatmul.mubr.bf16.gmra.mrb[56].mxu0 %v2837_v62 }
 0x156   :  { %680 = vmatprep.mubr.bf16.mxu0 %v2841_v63 }
 0x15d   :  { %681 = vmatmul.mubr.bf16.gmra.mrb[60].mxu0 %v2847_v20 }
 0x1b8   :  { %v1766_v21 = vpop.f32.mrb[0].mxu0 }
 0x1b9   :  { %v1767_v45 = vpop.f32.mrb[1].mxu0 }
 0x1ba   :  { %v1768_v40 = vadd.f32 %v1767_v45, %v1766_v21  ;;  %v1769_v48 = vpop.f32.mrb[2].mxu0 }
 0x1bb   :  { %v1770_v43 = vpop.f32.mrb[3].mxu0 }
 0x1bc   :  { %v689_v59 = vmul.f32 %v2511_v9, %v1768_v40  ;;  %v1771_v10 = vadd.f32 %v1770_v43, %v1769_v48 }
 0x1be   :  { %v727_v4 = vmul.f32 %v2853_v42, %v689_v59  ;;  %v690_v28 = vmul.f32 %v2521_v26, %v1771_v10 }
 0x1c0   :  { %v728_v21 = vmul.f32 %v2853_v42, %v690_v28  ;;  %v1772_v45 = vpop.f32.mrb[4].mxu0  ;;  %v765_v20 = vadd.f32 %v2859_v3, %v727_v4 }
 0x1c1   :  { %v1773_v63 = vpop.f32.mrb[5].mxu0 }
 0x1c2   :  { %v1774_v62 = vadd.f32 %v1773_v63, %v1772_v45  ;;  %v1775_v47 = vpop.f32.mrb[6].mxu0  ;;  %v766_v40 = vadd.f32 %v2859_v3, %v728_v21  ;;  %v797_v48 = vmax.f32 %v765_v20, 0.0 }
 0x1c3   :  { %v1776_v43 = vpop.f32.mrb[7].mxu0 }
 0x1c4   :  { %v691_v46 = vmul.f32 %v2545_v5, %v1774_v62  ;;  %v1777_v31 = vadd.f32 %v1776_v43, %v1775_v47  ;;  %v798_v30 = vmax.f32 %v766_v40, 0.0  ;;  %v2870_v28 = vmul.f32 %v2511_v9, %v797_v48 }
 0x1c6   :  { %v729_v59 = vmul.f32 %v2853_v42, %v691_v46  ;;  %v692_v10 = vmul.f32 %v2547_v15, %v1777_v31  ;;  %v2873_v4 = vmul.f32 %v2521_v26, %v798_v30 }
 0x1c8   :  { %v767_v63 = vadd.f32 %v2859_v3, %v729_v59  ;;  %v730_v21 = vmul.f32 %v2853_v42, %v692_v10  ;;  %v1778_v20 = vpop.f32.mrb[8].mxu0 }
 0x1c9   :  { %v1779_v47 = vpop.f32.mrb[9].mxu0 }
 0x1ca   :  { %v799_v45 = vmax.f32 %v767_v63, 0.0  ;;  %v768_v46 = vadd.f32 %v2859_v3, %v730_v21  ;;  %v1780_v40 = vadd.f32 %v1779_v47, %v1778_v20  ;;  %v1781_v31 = vpop.f32.mrb[10].mxu0 }
 0x1cb   :  { %v1782_v43 = vpop.f32.mrb[11].mxu0 }
 0x1cc   :  { %v800_v48 = vmax.f32 %v768_v46, 0.0  ;;  %v693_v9 = vmul.f32 %v2569_v57, %v1780_v40  ;;  %v1783_v30 = vadd.f32 %v1782_v43, %v1781_v31  ;;  %v2884_v10 = vmul.f32 %v2545_v5, %v799_v45 }
 0x1ce   :  { %v731_v26 = vmul.f32 %v2853_v42, %v693_v9  ;;  %v694_v59 = vmul.f32 %v2571_v6, %v1783_v30  ;;  %v2887_v62 = vmul.f32 %v2547_v15, %v800_v48 }
 0x1d0   :  { %v769_v63 = vadd.f32 %v2859_v3, %v731_v26  ;;  %v732_v21 = vmul.f32 %v2853_v42, %v694_v59  ;;  %v1784_v20 = vpop.f32.mrb[12].mxu0 }
 0x1d1   :  { %v1785_v46 = vpop.f32.mrb[13].mxu0 }
 0x1d2   :  { %v801_v40 = vmax.f32 %v769_v63, 0.0  ;;  %v770_v9 = vadd.f32 %v2859_v3, %v732_v21  ;;  %v1786_v31 = vadd.f32 %v1785_v46, %v1784_v20  ;;  %v1787_v43 = vpop.f32.mrb[14].mxu0 }
 0x1d3   :  { %v1788_v30 = vpop.f32.mrb[15].mxu0 }
 0x1d4   :  { %v802_v45 = vmax.f32 %v770_v9, 0.0  ;;  %v695_v5 = vmul.f32 %v2593_v58, %v1786_v31  ;;  %v1789_v48 = vadd.f32 %v1788_v30, %v1787_v43  ;;  %v2898_v59 = vmul.f32 %v2569_v57, %v801_v40 }
 0x1d6   :  { %v733_v15 = vmul.f32 %v2853_v42, %v695_v5  ;;  %v696_v26 = vmul.f32 %v2595_v14, %v1789_v48  ;;  %v2901_v47 = vmul.f32 %v2571_v6, %v802_v45 }
 0x1d8   :  { %v771_v63 = vadd.f32 %v2859_v3, %v733_v15  ;;  %v734_v21 = vmul.f32 %v2853_v42, %v696_v26  ;;  %v1790_v20 = vpop.f32.mrb[16].mxu0 }
 0x1d9   :  { %v1791_v9 = vpop.f32.mrb[17].mxu0 }
 0x1da   :  { %v803_v31 = vmax.f32 %v771_v63, 0.0  ;;  %v772_v5 = vadd.f32 %v2859_v3, %v734_v21  ;;  %v1792_v43 = vadd.f32 %v1791_v9, %v1790_v20  ;;  %v1793_v30 = vpop.f32.mrb[18].mxu0 }
 0x1db   :  { %v1794_v48 = vpop.f32.mrb[19].mxu0 }
 0x1dc   :  { %v804_v40 = vmax.f32 %v772_v5, 0.0  ;;  %v697_v57 = vmul.f32 %v2617_v18, %v1792_v43  ;;  %v1795_v45 = vadd.f32 %v1794_v48, %v1793_v30  ;;  %v2912_v26 = vmul.f32 %v2593_v58, %v803_v31 }
 0x1de   :  { %v735_v6 = vmul.f32 %v2853_v42, %v697_v57  ;;  %v698_v15 = vmul.f32 %v2619_v41, %v1795_v45  ;;  %v2915_v46 = vmul.f32 %v2595_v14, %v804_v40 }
 0x1e0   :  { %v773_v63 = vadd.f32 %v2859_v3, %v735_v6  ;;  %v736_v21 = vmul.f32 %v2853_v42, %v698_v15  ;;  %v1796_v20 = vpop.f32.mrb[20].mxu0 }
 0x1e1   :  { %v1797_v5 = vpop.f32.mrb[21].mxu0 }
 0x1e2   :  { %v805_v43 = vmax.f32 %v773_v63, 0.0  ;;  %v774_v57 = vadd.f32 %v2859_v3, %v736_v21  ;;  %v1798_v30 = vadd.f32 %v1797_v5, %v1796_v20  ;;  %v1799_v48 = vpop.f32.mrb[22].mxu0 }
 0x1e3   :  { %v1800_v45 = vpop.f32.mrb[23].mxu0 }
 0x1e4   :  { %v806_v31 = vmax.f32 %v774_v57, 0.0  ;;  %v699_v58 = vmul.f32 %v2641_v49, %v1798_v30  ;;  %v1801_v40 = vadd.f32 %v1800_v45, %v1799_v48  ;;  %v2926_v15 = vmul.f32 %v2617_v18, %v805_v43 }
 0x1e6   :  { %v737_v14 = vmul.f32 %v2853_v42, %v699_v58  ;;  %v700_v6 = vmul.f32 %v2643_v56, %v1801_v40  ;;  %v2929_v9 = vmul.f32 %v2619_v41, %v806_v31 }
 0x1e8   :  { %v775_v63 = vadd.f32 %v2859_v3, %v737_v14  ;;  %v738_v21 = vmul.f32 %v2853_v42, %v700_v6  ;;  %v1802_v20 = vpop.f32.mrb[24].mxu0 }
 0x1e9   :  { %v1803_v57 = vpop.f32.mrb[25].mxu0 }
 0x1ea   :  { %v807_v30 = vmax.f32 %v775_v63, 0.0  ;;  %v776_v58 = vadd.f32 %v2859_v3, %v738_v21  ;;  %v1804_v48 = vadd.f32 %v1803_v57, %v1802_v20  ;;  %v1805_v45 = vpop.f32.mrb[26].mxu0 }
 0x1eb   :  { %v1806_v40 = vpop.f32.mrb[27].mxu0 }
 0x1ec   :  { %v808_v43 = vmax.f32 %v776_v58, 0.0  ;;  %v701_v18 = vmul.f32 %v2665_v24, %v1804_v48  ;;  %v1807_v31 = vadd.f32 %v1806_v40, %v1805_v45  ;;  %v2940_v6 = vmul.f32 %v2641_v49, %v807_v30 }
 0x1ee   :  { %v739_v41 = vmul.f32 %v2853_v42, %v701_v18  ;;  %v702_v14 = vmul.f32 %v2667_v60, %v1807_v31  ;;  %v2943_v5 = vmul.f32 %v2643_v56, %v808_v43 }
 0x1f0   :  { %v777_v63 = vadd.f32 %v2859_v3, %v739_v41  ;;  %v740_v21 = vmul.f32 %v2853_v42, %v702_v14  ;;  %v1808_v20 = vpop.f32.mrb[28].mxu0 }
 0x1f1   :  { %v1809_v58 = vpop.f32.mrb[29].mxu0 }
 0x1f2   :  { %v809_v48 = vmax.f32 %v777_v63, 0.0  ;;  %v778_v18 = vadd.f32 %v2859_v3, %v740_v21  ;;  %v1810_v45 = vadd.f32 %v1809_v58, %v1808_v20  ;;  %v1811_v40 = vpop.f32.mrb[30].mxu0 }
 0x1f3   :  { %v1812_v31 = vpop.f32.mrb[31].mxu0 }
 0x1f4   :  { %v810_v30 = vmax.f32 %v778_v18, 0.0  ;;  %v703_v49 = vmul.f32 %v2689_v51, %v1810_v45  ;;  %v1813_v43 = vadd.f32 %v1812_v31, %v1811_v40  ;;  %v2954_v14 = vmul.f32 %v2665_v24, %v809_v48 }
 0x1f6   :  { %v741_v56 = vmul.f32 %v2853_v42, %v703_v49  ;;  %v704_v41 = vmul.f32 %v2691_v34, %v1813_v43  ;;  %v2957_v57 = vmul.f32 %v2667_v60, %v810_v30 }
 0x1f8   :  { %v779_v63 = vadd.f32 %v2859_v3, %v741_v56  ;;  %v742_v21 = vmul.f32 %v2853_v42, %v704_v41  ;;  %v1814_v20 = vpop.f32.mrb[32].mxu0 }
 0x1f9   :  { %v1815_v18 = vpop.f32.mrb[33].mxu0 }
 0x1fa   :  { %v811_v45 = vmax.f32 %v779_v63, 0.0  ;;  %v780_v49 = vadd.f32 %v2859_v3, %v742_v21  ;;  %v1816_v40 = vadd.f32 %v1815_v18, %v1814_v20  ;;  %v1817_v31 = vpop.f32.mrb[34].mxu0 }
 0x1fb   :  { %v1818_v43 = vpop.f32.mrb[35].mxu0 }
 0x1fc   :  { %v812_v48 = vmax.f32 %v780_v49, 0.0  ;;  %v705_v24 = vmul.f32 %v2503_v61, %v1816_v40  ;;  %v1819_v30 = vadd.f32 %v1818_v43, %v1817_v31  ;;  %v2968_v41 = vmul.f32 %v2689_v51, %v811_v45 }
 0x1fe   :  { %v743_v60 = vmul.f32 %v2853_v42, %v705_v24  ;;  %v706_v56 = vmul.f32 %v2519_v19, %v1819_v30  ;;  %v2971_v58 = vmul.f32 %v2691_v34, %v812_v48 }
 0x200   :  { %v744_v63 = vmul.f32 %v2853_v42, %v706_v56  ;;  %v1820_v21 = vpop.f32.mrb[36].mxu0  ;;  %v781_v20 = vadd.f32 %v2859_v3, %v743_v60 }
 0x201   :  { %v1821_v49 = vpop.f32.mrb[37].mxu0 }
 0x202   :  { %v1822_v40 = vadd.f32 %v1821_v49, %v1820_v21  ;;  %v1823_v31 = vpop.f32.mrb[38].mxu0  ;;  %v782_v24 = vadd.f32 %v2859_v3, %v744_v63  ;;  %v813_v43 = vmax.f32 %v781_v20, 0.0 }
 0x203   :  { %v1824_v30 = vpop.f32.mrb[39].mxu0 }
 0x204   :  { %v707_v45 = vmul.f32 %v2533_v44, %v1822_v40  ;;  %v1825_v51 = vadd.f32 %v1824_v30, %v1823_v31  ;;  %v814_v48 = vmax.f32 %v782_v24, 0.0  ;;  %v845_v60 = vmul.f32 %v2503_v61, %v813_v43 }
 0x206   :  { %v745_v34 = vmul.f32 %v2853_v42, %v707_v45  ;;  %v708_v56 = vmul.f32 %v2535_v50, %v1825_v51  ;;  %v846_v13 = vmul.f32 %v2519_v19, %v814_v48  ;;  %v3506_v51 = vpack.c.bf16 %v2873_v4, %v2870_v28  ;;  %v3507_v45 = vld [vmem:[#allocation7_spill] sm:$0xff]  ;;  %v3508_v19 = vld [vmem:[#allocation8_spill] sm:$0xff] }
 0x208   :  { %v783_v18 = vadd.f32 %v2859_v3, %v745_v34  ;;  %v746_v21 = vmul.f32 %v2853_v42, %v708_v56  ;;  %v1826_v49 = vpop.f32.mrb[40].mxu0  ;;  %v869_v63 = vpack.c.bf16 %v846_v13, %v845_v60 }
 0x209   :  { %v1827_v20 = vpop.f32.mrb[41].mxu0 }
 0x20a   :  { %v815_v8 = vmax.f32 %v783_v18, 0.0  ;;  %v784_v40 = vadd.f32 %v2859_v3, %v746_v21  ;;  %v1828_v31 = vadd.f32 %v1827_v20, %v1826_v49  ;;  %v1829_v24 = vpop.f32.mrb[42].mxu0  ;;  %1862 = vmatprep.subr.bf16.mxu1 %v869_v63 }
 0x20b   :  { %v1830_v30 = vpop.f32.mrb[43].mxu0  ;;  %1863 = vmatpush3.bf16.msra.mxu1 %v3506_v51  ;;  %v3509_v51 = vpack.c.bf16 %v2887_v62, %v2884_v10 }
 0x20c   :  { %v816_v43 = vmax.f32 %v784_v40, 0.0  ;;  %v709_v48 = vmul.f32 %v3507_v45, %v1828_v31  ;;  %v1831_v34 = vadd.f32 %v1830_v30, %v1829_v24  ;;  %v847_v18 = vmul.f32 %v2533_v44, %v815_v8 }
 0x20e   :  { %v747_v56 = vmul.f32 %v2853_v42, %v709_v48  ;;  %v710_v13 = vmul.f32 %v3508_v19, %v1831_v34  ;;  %v848_v60 = vmul.f32 %v2535_v50, %v816_v43  ;;  %v3510_v43 = vld [vmem:[#allocation11_spill] sm:$0xff] }
 0x210   :  { %v785_v21 = vadd.f32 %v2859_v3, %v747_v56  ;;  %v748_v49 = vmul.f32 %v2853_v42, %v710_v13  ;;  %v1832_v63 = vpop.f32.mrb[44].mxu0  ;;  %v870_v20 = vpack.c.bf16 %v848_v60, %v847_v18  ;;  %v3511_v13 = vld [vmem:[#allocation12_spill] sm:$0xff] }
 0x211   :  { %v1833_v28 = vpop.f32.mrb[45].mxu0 }
 0x212   :  { %v817_v4 = vmax.f32 %v785_v21, 0.0  ;;  %v786_v40 = vadd.f32 %v2859_v3, %v748_v49  ;;  %v1834_v31 = vadd.f32 %v1833_v28, %v1832_v63  ;;  %v1835_v24 = vpop.f32.mrb[46].mxu0  ;;  %1864 = vmatprep.subr.bf16.mxu1 %v870_v20 }
 0x213   :  { %v1836_v30 = vpop.f32.mrb[47].mxu0  ;;  %1865 = vmatpush3.bf16.msra.mxu1 %v3509_v51  ;;  %v3512_v51 = vpack.c.bf16 %v2901_v47, %v2898_v59 }
 0x214   :  { %v818_v8 = vmax.f32 %v786_v40, 0.0  ;;  %v711_v48 = vmul.f32 %v3510_v43, %v1834_v31  ;;  %v1837_v34 = vadd.f32 %v1836_v30, %v1835_v24  ;;  %v849_v60 = vmul.f32 %v3507_v45, %v817_v4 }
 0x216   :  { %v749_v56 = vmul.f32 %v2853_v42, %v711_v48  ;;  %v712_v18 = vmul.f32 %v3511_v13, %v1837_v34  ;;  %v850_v21 = vmul.f32 %v3508_v19, %v818_v8  ;;  %v3513_v8 = vld [vmem:[#allocation15_spill] sm:$0xff] }
 0x218   :  { %v787_v49 = vadd.f32 %v2859_v3, %v749_v56  ;;  %v750_v63 = vmul.f32 %v2853_v42, %v712_v18  ;;  %v1838_v20 = vpop.f32.mrb[48].mxu0  ;;  %v871_v28 = vpack.c.bf16 %v850_v21, %v849_v60  ;;  %v3514_v18 = vld [vmem:[#allocation16_spill] sm:$0xff] }
 0x219   :  { %v1839_v62 = vpop.f32.mrb[49].mxu0 }
 0x21a   :  { %v819_v10 = vmax.f32 %v787_v49, 0.0  ;;  %v788_v40 = vadd.f32 %v2859_v3, %v750_v63  ;;  %v1840_v31 = vadd.f32 %v1839_v62, %v1838_v20  ;;  %v1841_v24 = vpop.f32.mrb[50].mxu0  ;;  %1866 = vmatprep.subr.bf16.mxu1 %v871_v28 }
 0x21b   :  { %v1842_v30 = vpop.f32.mrb[51].mxu0  ;;  %1867 = vmatpush3.bf16.msra.mxu1 %v3512_v51  ;;  %v3515_v51 = vpack.c.bf16 %v2915_v46, %v2912_v26 }
 0x21c   :  { %v820_v4 = vmax.f32 %v788_v40, 0.0  ;;  %v713_v48 = vmul.f32 %v3513_v8, %v1840_v31  ;;  %v1843_v34 = vadd.f32 %v1842_v30, %v1841_v24  ;;  %v851_v21 = vmul.f32 %v3510_v43, %v819_v10 }
 0x21e   :  { %v751_v56 = vmul.f32 %v2853_v42, %v713_v48  ;;  %v714_v60 = vmul.f32 %v3514_v18, %v1843_v34  ;;  %v852_v49 = vmul.f32 %v3511_v13, %v820_v4  ;;  %v3516_v4 = vld [vmem:[#allocation19_spill] sm:$0xff] }
 0x220   :  { %v789_v63 = vadd.f32 %v2859_v3, %v751_v56  ;;  %v752_v20 = vmul.f32 %v2853_v42, %v714_v60  ;;  %v1844_v28 = vpop.f32.mrb[52].mxu0  ;;  %v872_v62 = vpack.c.bf16 %v852_v49, %v851_v21  ;;  %v3517_v60 = vld [vmem:[#allocation20_spill] sm:$0xff] }
 0x221   :  { %v1845_v47 = vpop.f32.mrb[53].mxu0 }
 0x222   :  { %v821_v59 = vmax.f32 %v789_v63, 0.0  ;;  %v790_v40 = vadd.f32 %v2859_v3, %v752_v20  ;;  %v1846_v31 = vadd.f32 %v1845_v47, %v1844_v28  ;;  %v1847_v24 = vpop.f32.mrb[54].mxu0  ;;  %1868 = vmatprep.subr.bf16.mxu1 %v872_v62 }
 0x223   :  { %v1848_v30 = vpop.f32.mrb[55].mxu0  ;;  %1869 = vmatpush3.bf16.msra.mxu1 %v3515_v51  ;;  %v3518_v51 = vpack.c.bf16 %v2929_v9, %v2926_v15 }
 0x224   :  { %v822_v10 = vmax.f32 %v790_v40, 0.0  ;;  %v715_v48 = vmul.f32 %v3516_v4, %v1846_v31  ;;  %v1849_v34 = vadd.f32 %v1848_v30, %v1847_v24  ;;  %v853_v49 = vmul.f32 %v3513_v8, %v821_v59 }
 0x226   :  { %v753_v56 = vmul.f32 %v2853_v42, %v715_v48  ;;  %v716_v21 = vmul.f32 %v3517_v60, %v1849_v34  ;;  %v854_v63 = vmul.f32 %v3514_v18, %v822_v10  ;;  %v3519_v10 = vld [vmem:[#allocation23_spill] sm:$0xff] }
 0x228   :  { %v791_v20 = vadd.f32 %v2859_v3, %v753_v56  ;;  %v754_v28 = vmul.f32 %v2853_v42, %v716_v21  ;;  %v1850_v62 = vpop.f32.mrb[56].mxu0  ;;  %v873_v47 = vpack.c.bf16 %v854_v63, %v853_v49  ;;  %v3520_v21 = vld [vmem:[#allocation24_spill] sm:$0xff] }
 0x229   :  { %v1851_v46 = vpop.f32.mrb[57].mxu0 }
 0x22a   :  { %v823_v26 = vmax.f32 %v791_v20, 0.0  ;;  %v792_v40 = vadd.f32 %v2859_v3, %v754_v28  ;;  %v1852_v31 = vadd.f32 %v1851_v46, %v1850_v62  ;;  %v1853_v24 = vpop.f32.mrb[58].mxu0  ;;  %1870 = vmatprep.subr.bf16.mxu1 %v873_v47 }
 0x22b   :  { %v1854_v30 = vpop.f32.mrb[59].mxu0  ;;  %1871 = vmatpush3.bf16.msra.mxu1 %v3518_v51  ;;  %v3521_v51 = vpack.c.bf16 %v2943_v5, %v2940_v6  ;;  %v3522_v6 = vpack.c.bf16 %v2957_v57, %v2954_v14  ;;  %v2152_v57 = vld [vmem:[%s3419_s4 + $0x10] sm:$0xff]   ;;  %v3523_v14 = vpack.c.bf16 %v2971_v58, %v2968_v41 }
 0x22c   :  { %v824_v59 = vmax.f32 %v792_v40, 0.0  ;;  %v717_v48 = vmul.f32 %v3519_v10, %v1852_v31  ;;  %v1855_v34 = vadd.f32 %v1854_v30, %v1853_v24  ;;  %v855_v63 = vmul.f32 %v3516_v4, %v823_v26  ;;  %v3534_v58 = vld [vmem:[#allocation4_spill] sm:$0xff] }
 0x22e   :  { %v755_v56 = vmul.f32 %v2853_v42, %v717_v48  ;;  %v718_v49 = vmul.f32 %v3520_v21, %v1855_v34  ;;  %v856_v20 = vmul.f32 %v3517_v60, %v824_v59 }
 0x230   :  { %v793_v28 = vadd.f32 %v2859_v3, %v755_v56  ;;  %v756_v62 = vmul.f32 %v2853_v42, %v718_v49  ;;  %v1856_v47 = vpop.f32.mrb[60].mxu0  ;;  %v874_v46 = vpack.c.bf16 %v856_v20, %v855_v63 }
 0x231   :  { %v1857_v9 = vpop.f32.mrb[61].mxu0 }
 0x232   :  { %v825_v15 = vmax.f32 %v793_v28, 0.0  ;;  %v794_v40 = vadd.f32 %v2859_v3, %v756_v62  ;;  %v1858_v31 = vadd.f32 %v1857_v9, %v1856_v47  ;;  %v1859_v24 = vpop.f32.mrb[62].mxu0  ;;  %1872 = vmatprep.subr.bf16.mxu1 %v874_v46 }
 0x233   :  { %v1860_v30 = vpop.f32.mrb[63].mxu0  ;;  %1873 = vmatpush3.bf16.msra.mxu1 %v3521_v51 }
 0x234   :  { %v826_v26 = vmax.f32 %v794_v40, 0.0  ;;  %v719_v59 = vmul.f32 %v2677_v25, %v1858_v31  ;;  %v1861_v48 = vadd.f32 %v1860_v30, %v1859_v24  ;;  %v857_v49 = vmul.f32 %v3519_v10, %v825_v15  ;;  %v2150_v40 = vld [vmem:[%s3419_s4] sm:$0xff]   ;;  %v2151_v24 = vld [vmem:[%s3419_s4 + $0x8] sm:$0xff]   ;;  %v2153_v30 = vld [vmem:[%s3419_s4 + $0x18] sm:$0xff]  }
 0x235   :  { %2022 = vmatprep.subr.bf16.mxu0 %v2150_v40 }
 0x236   :  { %v757_v34 = vmul.f32 %v2853_v42, %v719_v59  ;;  %v720_v56 = vmul.f32 %v2679_v35, %v1861_v48  ;;  %v858_v63 = vmul.f32 %v3520_v21, %v826_v26  ;;  %2023 = vmatpush3.bf16.msra.mxu0 %v2150_v40  ;;  %v3536_v40 = vld [vmem:[#allocation6_spill] sm:$0xff] }
 0x237   :  { %2024 = vmatprep.subr.bf16.mxu0 %v2151_v24 }
 0x238   :  { %v795_v20 = vadd.f32 %v2859_v3, %v757_v34  ;;  %v758_v28 = vmul.f32 %v2853_v42, %v720_v56  ;;  %v875_v62 = vpack.c.bf16 %v858_v63, %v857_v49  ;;  %v2158_v34 = vld [vmem:[%s3420_s6] sm:$0xff]  }
 0x23a   :  { %v827_v47 = vmax.f32 %v795_v20, 0.0  ;;  %v796_v5 = vadd.f32 %v2859_v3, %v758_v28  ;;  %1874 = vmatprep.subr.bf16.mxu1 %v875_v62  ;;  %2025 = vmatpush3.bf16.msra.mxu0 %v2151_v24  ;;  %v2159_v28 = vld [vmem:[%s3420_s6 + $0x8] sm:$0xff]   ;;  %v3535_v62 = vld [vmem:[#allocation5_spill] sm:$0xff] }
 0x23b   :  { %1875 = vmatpush3.bf16.msra.mxu1 %v3522_v6  ;;  %2026 = vmatprep.subr.bf16.mxu0 %v2152_v57 }
 0x23c   :  { %v828_v46 = vmax.f32 %v796_v5, 0.0  ;;  %v859_v9 = vmul.f32 %v2677_v25, %v827_v47 }
 0x23e   :  { %v860_v15 = vmul.f32 %v2679_v35, %v828_v46  ;;  %2027 = vmatpush3.bf16.msra.mxu0 %v2152_v57 }
 0x23f   :  { %2028 = vmatprep.subr.bf16.mxu0 %v2153_v30 }
 0x240   :  { %v876_v31 = vpack.c.bf16 %v860_v15, %v859_v9  ;;  %v2160_v9 = vld [vmem:[%s3420_s6 + $0x10] sm:$0xff]  }
 0x242   :  { %1876 = vmatprep.subr.bf16.mxu1 %v876_v31  ;;  %2029 = vmatpush3.bf16.msra.mxu0 %v2153_v30 }
 0x243   :  { %1877 = vmatpush3.bf16.msra.mxu1 %v3523_v14 }
 0x244   :  { %2070 = vmatprep.subr.bf16.mxu1 %v2158_v34 }
 0x246   :  { %910 = vmatmul.mubr.bf16.vlgmr.msra.gmra.mrb[0].mxu1 %v2697_v27  ;;  %v3524_v27 = vld [vmem:[#allocation29_spill] sm:$0xff] }
 0x247   :  { %917 = vmatprep.mubr.bf16.mxu1 %v2701_v29  ;;  %v3525_v29 = vld [vmem:[#allocation30_spill] sm:$0xff]  ;;  %2071 = vmatpush3.bf16.msra.mxu1 %v2158_v34 }
 0x248   :  { %2072 = vmatprep.subr.bf16.mxu1 %v2159_v28 }
 0x24b   :  { %2073 = vmatpush3.bf16.msra.mxu1 %v2159_v28 }
 0x24c   :  { %2074 = vmatprep.subr.bf16.mxu1 %v2160_v9 }
 0x24e   :  { %918 = vmatmul.mubr.bf16.gmra.mrb[4].mxu1 %v2707_v36  ;;  %v2154_v36 = vld [vmem:[%s3419_s4 + $0x20] sm:$0xff]  }
 0x24f   :  { %925 = vmatprep.mubr.bf16.mxu1 %v2711_v37  ;;  %2030 = vmatprep.subr.bf16.mxu0 %v2154_v36  ;;  %v2155_v37 = vld [vmem:[%s3419_s4 + $0x28] sm:$0xff]  }
 0x250   :  { %2031 = vmatpush3.bf16.msra.mxu0 %v2154_v36  ;;  %2075 = vmatpush3.bf16.msra.mxu1 %v2160_v9 }
 0x251   :  { %2032 = vmatprep.subr.bf16.mxu0 %v2155_v37 }
 0x254   :  { %2033 = vmatpush3.bf16.msra.mxu0 %v2155_v37 }
 0x256   :  { %926 = vmatmul.mubr.bf16.gmra.mrb[8].mxu1 %v2717_v1  ;;  %v3526_v1 = vld [vmem:[#allocation31_spill] sm:$0xff] }
 0x257   :  { %933 = vmatprep.mubr.bf16.mxu1 %v2721_v7  ;;  %v3527_v7 = vld [vmem:[#allocation32_spill] sm:$0xff] }
 0x25e   :  { %934 = vmatmul.mubr.bf16.gmra.mrb[12].mxu1 %v2727_v22  ;;  %v2156_v22 = vld [vmem:[%s3419_s4 + $0x30] sm:$0xff]  }
 0x25f   :  { %941 = vmatprep.mubr.bf16.mxu1 %v2731_v23  ;;  %2034 = vmatprep.subr.bf16.mxu0 %v2156_v22  ;;  %v2157_v23 = vld [vmem:[%s3419_s4 + $0x38] sm:$0xff]  }
 0x260   :  { %2035 = vmatpush3.bf16.msra.mxu0 %v2156_v22 }
 0x261   :  { %2036 = vmatprep.subr.bf16.mxu0 %v2157_v23 }
 0x264   :  { %2037 = vmatpush3.bf16.msra.mxu0 %v2157_v23 }
 0x266   :  { %942 = vmatmul.mubr.bf16.gmra.mrb[16].mxu1 %v2737_v38  ;;  %v3528_v38 = vld [vmem:[#allocation33_spill] sm:$0xff] }
 0x267   :  { %949 = vmatprep.mubr.bf16.mxu1 %v2741_v39  ;;  %v3529_v39 = vld [vmem:[#allocation34_spill] sm:$0xff] }
 0x26e   :  { %950 = vmatmul.mubr.bf16.gmra.mrb[20].mxu1 %v2747_v54  ;;  %v3530_v54 = vld [vmem:[#allocation35_spill] sm:$0xff] }
 0x26f   :  { %957 = vmatprep.mubr.bf16.mxu1 %v2751_v55  ;;  %v3531_v55 = vld [vmem:[#allocation36_spill] sm:$0xff] }
 0x276   :  { %958 = vmatmul.mubr.bf16.gmra.mrb[24].mxu1 %v2757_v11  ;;  %v3532_v11 = vld [vmem:[#allocation37_spill] sm:$0xff] }
 0x277   :  { %965 = vmatprep.mubr.bf16.mxu1 %v2761_v12 }
 0x27e   :  { %966 = vmatmul.mubr.bf16.gmra.mrb[28].mxu1 %v2767_v32 }
 0x27f   :  { %973 = vmatprep.mubr.bf16.mxu1 %v2771_v33 }
 0x286   :  { %974 = vmatmul.mubr.bf16.gmra.mrb[32].mxu1 %v2777_v52 }
 0x287   :  { %981 = vmatprep.mubr.bf16.mxu1 %v2781_v53 }
 0x28e   :  { %982 = vmatmul.mubr.bf16.gmra.mrb[36].mxu1 %v2787_v16  ;;  %v3533_v16 = vld [vmem:[#allocation2_spill] sm:$0xff] }
 0x28f   :  { %989 = vmatprep.mubr.bf16.mxu1 %v2791_v17 }
 0x296   :  { %990 = vmatmul.mubr.bf16.gmra.mrb[40].mxu1 %v2797_v0 }
 0x297   :  { %997 = vmatprep.mubr.bf16.mxu1 %v2801_v2 }
 0x29e   :  { %998 = vmatmul.mubr.bf16.gmra.mrb[44].mxu1 %v3524_v27 }
 0x29f   :  { %1005 = vmatprep.mubr.bf16.mxu1 %v3525_v29  ;;  %v2161_v29 = vld [vmem:[%s3420_s6 + $0x18] sm:$0xff]  }
 0x2a0   :  { %2076 = vmatprep.subr.bf16.mxu1 %v2161_v29 }
 0x2a1   :  { %2077 = vmatpush3.bf16.msra.mxu1 %v2161_v29  ;;  %v3542_v29 = vld [vmem:[#allocation18_spill] sm:$0xff] }
 0x2a6   :  { %1006 = vmatmul.mubr.bf16.gmra.mrb[48].mxu1 %v3526_v1 }
 0x2a7   :  { %1013 = vmatprep.mubr.bf16.mxu1 %v3527_v7 }
 0x2ae   :  { %1014 = vmatmul.mubr.bf16.gmra.mrb[52].mxu1 %v3528_v38  ;;  %v3537_v38 = vld [vmem:[#allocation9_spill] sm:$0xff] }
 0x2af   :  { %1021 = vmatprep.mubr.bf16.mxu1 %v3529_v39 }
 0x2b6   :  { %1022 = vmatmul.mubr.bf16.gmra.mrb[56].mxu1 %v3530_v54 }
 0x2b7   :  { %1029 = vmatprep.mubr.bf16.mxu1 %v3531_v55  ;;  %v2162_v55 = vld [vmem:[%s3420_s6 + $0x20] sm:$0xff]  }
 0x2b8   :  { %2078 = vmatprep.subr.bf16.mxu1 %v2162_v55 }
 0x2b9   :  { %2079 = vmatpush3.bf16.msra.mxu1 %v2162_v55 }
 0x2be   :  { %1030 = vmatmul.mubr.bf16.gmra.mrb[60].mxu1 %v3532_v11 }
 0x319   :  { %v1878_v12 = vpop.f32.mrb[0].mxu1 }
 0x31a   :  { %v1879_v32 = vpop.f32.mrb[1].mxu1 }
 0x31b   :  { %v1880_v33 = vadd.f32 %v1879_v32, %v1878_v12  ;;  %v1881_v52 = vpop.f32.mrb[2].mxu1  ;;  %v3538_v32 = vld [vmem:[#allocation10_spill] sm:$0xff] }
 0x31c   :  { %v1882_v53 = vpop.f32.mrb[3].mxu1 }
 0x31d   :  { %v1038_v17 = vmul.f32 %v3533_v16, %v1880_v33  ;;  %v1883_v0 = vadd.f32 %v1882_v53, %v1881_v52 }
 0x31f   :  { %v1070_v2 = vmul.f32 %v2853_v42, %v1038_v17  ;;  %v1039_v41 = vmul.f32 %v3534_v58, %v1883_v0  ;;  %v2163_v0 = vld [vmem:[%s3420_s6 + $0x28] sm:$0xff]  }
 0x320   :  { %2080 = vmatprep.subr.bf16.mxu1 %v2163_v0 }
 0x321   :  { %v1071_v51 = vmul.f32 %v2853_v42, %v1039_v41  ;;  %v1884_v26 = vpop.f32.mrb[4].mxu1  ;;  %v1102_v59 = vadd.f32 %v2859_v3, %v1070_v2  ;;  %2081 = vmatpush3.bf16.msra.mxu1 %v2163_v0 }
 0x322   :  { %v1885_v48 = vpop.f32.mrb[5].mxu1 }
 0x323   :  { %v1886_v56 = vadd.f32 %v1885_v48, %v1884_v26  ;;  %v1887_v49 = vpop.f32.mrb[6].mxu1  ;;  %v1103_v63 = vadd.f32 %v2859_v3, %v1071_v51  ;;  %v1134_v6 = vmax.f32 %v1102_v59, 0.0  ;;  %v3539_v26 = vld [vmem:[#allocation13_spill] sm:$0xff] }
 0x324   :  { %v1888_v20 = vpop.f32.mrb[7].mxu1 }
 0x325   :  { %v1040_v47 = vmul.f32 %v3535_v62, %v1886_v56  ;;  %v1889_v5 = vadd.f32 %v1888_v20, %v1887_v49  ;;  %v1135_v46 = vmax.f32 %v1103_v63, 0.0  ;;  %v3540_v63 = vld [vmem:[#allocation14_spill] sm:$0xff] }
 0x327   :  { %v1072_v15 = vmul.f32 %v2853_v42, %v1040_v47  ;;  %v1041_v31 = vmul.f32 %v3536_v40, %v1889_v5  ;;  %v1166_v24 = vpack.c.bf16 %v1135_v46, %v1134_v6 }
 0x329   :  { %v1104_v57 = vadd.f32 %v2859_v3, %v1072_v15  ;;  %v1073_v14 = vmul.f32 %v2853_v42, %v1041_v31  ;;  %v1890_v30 = vpop.f32.mrb[8].mxu1  ;;  %2038 = vmatprep.mubr.bf16.mxu0 %v1166_v24  ;;  %v3541_v31 = vld [vmem:[#allocation17_spill] sm:$0xff] }
 0x32a   :  { %v1891_v27 = vpop.f32.mrb[9].mxu1 }
 0x32b   :  { %v1105_v36 = vadd.f32 %v2859_v3, %v1073_v14  ;;  %v1892_v37 = vadd.f32 %v1891_v27, %v1890_v30  ;;  %v1893_v1 = vpop.f32.mrb[10].mxu1  ;;  %v1136_v22 = vmax.f32 %v1104_v57, 0.0 }
 0x32c   :  { %v1894_v7 = vpop.f32.mrb[11].mxu1 }
 0x32d   :  { %v1137_v23 = vmax.f32 %v1105_v36, 0.0  ;;  %v1042_v39 = vmul.f32 %v3537_v38, %v1892_v37  ;;  %v1895_v54 = vadd.f32 %v1894_v7, %v1893_v1 }
 0x32f   :  { %v1167_v11 = vpack.c.bf16 %v1137_v23, %v1136_v22  ;;  %v1074_v12 = vmul.f32 %v2853_v42, %v1042_v39  ;;  %v1043_v33 = vmul.f32 %v3538_v32, %v1895_v54 }
 0x331   :  { %v1075_v52 = vmul.f32 %v2853_v42, %v1043_v33  ;;  %v1896_v53 = vpop.f32.mrb[12].mxu1  ;;  %2039 = vmatmul.mubr.bf16.vlgmr.msra.gmra.mrb[64].mxu0 %v1167_v11  ;;  %v1106_v16 = vadd.f32 %v2859_v3, %v1074_v12  ;;  %v3543_v11 = vld [vmem:[#allocation21_spill] sm:$0xff] }
 0x332   :  { %v1897_v17 = vpop.f32.mrb[13].mxu1 }
 0x333   :  { %v1898_v2 = vadd.f32 %v1897_v17, %v1896_v53  ;;  %v1899_v58 = vpop.f32.mrb[14].mxu1  ;;  %v1107_v41 = vadd.f32 %v2859_v3, %v1075_v52  ;;  %v1138_v34 = vmax.f32 %v1106_v16, 0.0  ;;  %v3544_v16 = vld [vmem:[#allocation22_spill] sm:$0xff] }
 0x334   :  { %v1900_v51 = vpop.f32.mrb[15].mxu1 }
 0x335   :  { %v1044_v59 = vmul.f32 %v3539_v26, %v1898_v2  ;;  %v1901_v48 = vadd.f32 %v1900_v51, %v1899_v58  ;;  %v1139_v56 = vmax.f32 %v1107_v41, 0.0 }
 0x337   :  { %v1076_v49 = vmul.f32 %v2853_v42, %v1044_v59  ;;  %v1045_v20 = vmul.f32 %v3540_v63, %v1901_v48  ;;  %v1168_v28 = vpack.c.bf16 %v1139_v56, %v1138_v34  ;;  %v3545_v56 = vld [vmem:[#allocation25_spill] sm:$0xff] }
 0x339   :  { %v1077_v62 = vmul.f32 %v2853_v42, %v1045_v20  ;;  %v1902_v47 = vpop.f32.mrb[16].mxu1  ;;  %2042 = vmatprep.mubr.bf16.mxu0 %v1168_v28  ;;  %v1108_v5 = vadd.f32 %v2859_v3, %v1076_v49 }
 0x33a   :  { %v1903_v6 = vpop.f32.mrb[17].mxu1 }
 0x33b   :  { %v1904_v46 = vadd.f32 %v1903_v6, %v1902_v47  ;;  %v1905_v9 = vpop.f32.mrb[18].mxu1  ;;  %v1109_v15 = vadd.f32 %v2859_v3, %v1077_v62  ;;  %v1140_v14 = vmax.f32 %v1108_v5, 0.0  ;;  %v3546_v47 = vld [vmem:[#allocation26_spill] sm:$0xff] }
 0x33c   :  { %v1906_v40 = vpop.f32.mrb[19].mxu1 }
 0x33d   :  { %v1046_v24 = vmul.f32 %v3541_v31, %v1904_v46  ;;  %v1907_v57 = vadd.f32 %v1906_v40, %v1905_v9  ;;  %v1141_v30 = vmax.f32 %v1109_v15, 0.0 }
 0x33f   :  { %v1078_v27 = vmul.f32 %v2853_v42, %v1046_v24  ;;  %v1047_v36 = vmul.f32 %v3542_v29, %v1907_v57  ;;  %v1169_v37 = vpack.c.bf16 %v1141_v30, %v1140_v14  ;;  %v3547_v30 = vld [vmem:[#allocation27_spill] sm:$0xff] }
 0x341   :  { %v1079_v1 = vmul.f32 %v2853_v42, %v1047_v36  ;;  %v1908_v7 = vpop.f32.mrb[20].mxu1  ;;  %2043 = vmatmul.mubr.bf16.gmra.mrb[68].mxu0 %v1169_v37  ;;  %v1110_v22 = vadd.f32 %v2859_v3, %v1078_v27 }
 0x342   :  { %v1909_v23 = vpop.f32.mrb[21].mxu1 }
 0x343   :  { %v1910_v38 = vadd.f32 %v1909_v23, %v1908_v7  ;;  %v1911_v39 = vpop.f32.mrb[22].mxu1  ;;  %v1111_v54 = vadd.f32 %v2859_v3, %v1079_v1  ;;  %v1142_v33 = vmax.f32 %v1110_v22, 0.0  ;;  %v3548_v7 = vld [vmem:[#allocation28_spill] sm:$0xff] }
 0x344   :  { %v1912_v55 = vpop.f32.mrb[23].mxu1 }
 0x345   :  { %v1048_v12 = vmul.f32 %v3543_v11, %v1910_v38  ;;  %v1913_v32 = vadd.f32 %v1912_v55, %v1911_v39  ;;  %v1143_v52 = vmax.f32 %v1111_v54, 0.0  ;;  %v3181_v38 = vld [vmem:[%s3417_s2] ss:$0 sm:$0xff] }
 0x347   :  { %v1080_v53 = vmul.f32 %v2853_v42, %v1048_v12  ;;  %v1049_v17 = vmul.f32 %v3544_v16, %v1913_v32  ;;  %v1170_v0 = vpack.c.bf16 %v1143_v52, %v1142_v33 }
 0x349   :  { %v1081_v2 = vmul.f32 %v2853_v42, %v1049_v17  ;;  %v1914_v58 = vpop.f32.mrb[24].mxu1  ;;  %2046 = vmatprep.mubr.bf16.mxu0 %v1170_v0  ;;  %v1112_v41 = vadd.f32 %v2859_v3, %v1080_v53 }
 0x34a   :  { %v1915_v51 = vpop.f32.mrb[25].mxu1 }
 0x34b   :  { %v1916_v26 = vadd.f32 %v1915_v51, %v1914_v58  ;;  %v1917_v59 = vpop.f32.mrb[26].mxu1  ;;  %v1113_v48 = vadd.f32 %v2859_v3, %v1081_v2  ;;  %v1144_v20 = vmax.f32 %v1112_v41, 0.0  ;;  %v3549_v2 = vld [vmem:[#allocation3_spill] sm:$0xff] }
 0x34c   :  { %v1918_v34 = vpop.f32.mrb[27].mxu1 }
 0x34d   :  { %v1050_v49 = vmul.f32 %v3545_v56, %v1916_v26  ;;  %v1919_v63 = vadd.f32 %v1918_v34, %v1917_v59  ;;  %v1145_v28 = vmax.f32 %v1113_v48, 0.0 }
 0x34f   :  { %v1082_v62 = vmul.f32 %v2853_v42, %v1050_v49  ;;  %v1051_v5 = vmul.f32 %v3546_v47, %v1919_v63  ;;  %v1171_v6 = vpack.c.bf16 %v1145_v28, %v1144_v20 }
 0x351   :  { %v1083_v46 = vmul.f32 %v2853_v42, %v1051_v5  ;;  %v1920_v9 = vpop.f32.mrb[28].mxu1  ;;  %2047 = vmatmul.mubr.bf16.gmra.mrb[72].mxu0 %v1171_v6  ;;  %v1114_v15 = vadd.f32 %v2859_v3, %v1082_v62 }
 0x352   :  { %v1921_v40 = vpop.f32.mrb[29].mxu1 }
 0x353   :  { %v1922_v31 = vadd.f32 %v1921_v40, %v1920_v9  ;;  %v1923_v24 = vpop.f32.mrb[30].mxu1  ;;  %v1115_v57 = vadd.f32 %v2859_v3, %v1083_v46  ;;  %v1146_v36 = vmax.f32 %v1114_v15, 0.0  ;;  %v3187_v3 = vld [vmem:[%s3418_s3] ss:$0 sm:$0xff] }
 0x354   :  { %v1924_v14 = vpop.f32.mrb[31].mxu1 }
 0x355   :  { %v1052_v27 = vmul.f32 %v3547_v30, %v1922_v31  ;;  %v1925_v29 = vadd.f32 %v1924_v14, %v1923_v24  ;;  %v1147_v37 = vmax.f32 %v1115_v57, 0.0 }
 0x357   :  { %v1084_v1 = vmul.f32 %v2853_v42, %v1052_v27  ;;  %v1053_v22 = vmul.f32 %v3548_v7, %v1925_v29  ;;  %v1172_v23 = vpack.c.bf16 %v1147_v37, %v1146_v36 }
 0x359   :  { %v1085_v39 = vmul.f32 %v3181_v38, %v1053_v22  ;;  %v1926_v54 = vpop.f32.mrb[32].mxu1  ;;  %2050 = vmatprep.mubr.bf16.mxu0 %v1172_v23  ;;  %v1116_v55 = vadd.f32 %v3187_v3, %v1084_v1 }
 0x35a   :  { %v1927_v42 = vpop.f32.mrb[33].mxu1 }
 0x35b   :  { %v1928_v11 = vadd.f32 %v1927_v42, %v1926_v54  ;;  %v1929_v12 = vpop.f32.mrb[34].mxu1  ;;  %v1117_v32 = vadd.f32 %v3187_v3, %v1085_v39  ;;  %v1148_v16 = vmax.f32 %v1116_v55, 0.0 }
 0x35c   :  { %v1930_v33 = vpop.f32.mrb[35].mxu1 }
 0x35d   :  { %v1054_v52 = vmul.f32 %v2503_v61, %v1928_v11  ;;  %v1931_v53 = vadd.f32 %v1930_v33, %v1929_v12  ;;  %v1149_v17 = vmax.f32 %v1117_v32, 0.0 }
 0x35f   :  { %v1086_v0 = vmul.f32 %v3181_v38, %v1054_v52  ;;  %v1055_v58 = vmul.f32 %v3549_v2, %v1931_v53  ;;  %v1173_v41 = vpack.c.bf16 %v1149_v17, %v1148_v16 }
 0x361   :  { %v1087_v51 = vmul.f32 %v3181_v38, %v1055_v58  ;;  %v1932_v26 = vpop.f32.mrb[36].mxu1  ;;  %2051 = vmatmul.mubr.bf16.gmra.mrb[76].mxu0 %v1173_v41  ;;  %v1118_v59 = vadd.f32 %v3187_v3, %v1086_v0 }
 0x362   :  { %v1933_v48 = vpop.f32.mrb[37].mxu1 }
 0x363   :  { %v1934_v34 = vadd.f32 %v1933_v48, %v1932_v26  ;;  %v1935_v56 = vpop.f32.mrb[38].mxu1  ;;  %v1119_v49 = vadd.f32 %v3187_v3, %v1087_v51  ;;  %v1150_v28 = vmax.f32 %v1118_v59, 0.0 }
 0x364   :  { %v1936_v61 = vpop.f32.mrb[39].mxu1 }
 0x365   :  { %v1056_v63 = vmul.f32 %v2533_v44, %v1934_v34  ;;  %v1937_v20 = vadd.f32 %v1936_v61, %v1935_v56  ;;  %v1151_v62 = vmax.f32 %v1119_v49, 0.0 }
 0x367   :  { %v1088_v47 = vmul.f32 %v3181_v38, %v1056_v63  ;;  %v1057_v5 = vmul.f32 %v2535_v50, %v1937_v20  ;;  %v1174_v6 = vpack.c.bf16 %v1151_v62, %v1150_v28 }
 0x369   :  { %v1089_v46 = vmul.f32 %v3181_v38, %v1057_v5  ;;  %v1938_v9 = vpop.f32.mrb[40].mxu1  ;;  %2054 = vmatprep.mubr.bf16.mxu0 %v1174_v6  ;;  %v1120_v15 = vadd.f32 %v3187_v3, %v1088_v47 }
 0x36a   :  { %v1939_v40 = vpop.f32.mrb[41].mxu1 }
 0x36b   :  { %v1940_v31 = vadd.f32 %v1939_v40, %v1938_v9  ;;  %v1941_v24 = vpop.f32.mrb[42].mxu1  ;;  %v1121_v57 = vadd.f32 %v3187_v3, %v1089_v46  ;;  %v1152_v27 = vmax.f32 %v1120_v15, 0.0 }
 0x36c   :  { %v1942_v44 = vpop.f32.mrb[43].mxu1 }
 0x36d   :  { %v1058_v14 = vmul.f32 %v3507_v45, %v1940_v31  ;;  %v1943_v30 = vadd.f32 %v1942_v44, %v1941_v24  ;;  %v1153_v29 = vmax.f32 %v1121_v57, 0.0  ;;  %v2165_v24 = vld [vmem:[%s3420_s6 + $0x38] sm:$0xff]  }
 0x36f   :  { %v1090_v50 = vmul.f32 %v3181_v38, %v1058_v14  ;;  %v1059_v36 = vmul.f32 %v3508_v19, %v1943_v30  ;;  %v1175_v37 = vpack.c.bf16 %v1153_v29, %v1152_v27 }
 0x371   :  { %v1091_v1 = vmul.f32 %v3181_v38, %v1059_v36  ;;  %v1944_v7 = vpop.f32.mrb[44].mxu1  ;;  %2055 = vmatmul.mubr.bf16.gmra.mrb[80].mxu0 %v1175_v37  ;;  %v1122_v22 = vadd.f32 %v3187_v3, %v1090_v50 }
 0x372   :  { %v1945_v23 = vpop.f32.mrb[45].mxu1 }
 0x373   :  { %v1946_v39 = vadd.f32 %v1945_v23, %v1944_v7  ;;  %v1947_v54 = vpop.f32.mrb[46].mxu1  ;;  %v1123_v55 = vadd.f32 %v3187_v3, %v1091_v1  ;;  %v1154_v12 = vmax.f32 %v1122_v22, 0.0 }
 0x374   :  { %v1948_v45 = vpop.f32.mrb[47].mxu1 }
 0x375   :  { %v1060_v42 = vmul.f32 %v3510_v43, %v1946_v39  ;;  %v1949_v11 = vadd.f32 %v1948_v45, %v1947_v54  ;;  %v1155_v32 = vmax.f32 %v1123_v55, 0.0 }
 0x377   :  { %v1092_v19 = vmul.f32 %v3181_v38, %v1060_v42  ;;  %v1061_v33 = vmul.f32 %v3511_v13, %v1949_v11  ;;  %v1176_v52 = vpack.c.bf16 %v1155_v32, %v1154_v12 }
 0x379   :  { %v1093_v53 = vmul.f32 %v3181_v38, %v1061_v33  ;;  %v1950_v16 = vpop.f32.mrb[48].mxu1  ;;  %2058 = vmatprep.mubr.bf16.mxu0 %v1176_v52  ;;  %v1124_v17 = vadd.f32 %v3187_v3, %v1092_v19 }
 0x37a   :  { %v1951_v0 = vpop.f32.mrb[49].mxu1 }
 0x37b   :  { %v1952_v2 = vadd.f32 %v1951_v0, %v1950_v16  ;;  %v1953_v58 = vpop.f32.mrb[50].mxu1  ;;  %v1125_v41 = vadd.f32 %v3187_v3, %v1093_v53  ;;  %v1156_v59 = vmax.f32 %v1124_v17, 0.0 }
 0x37c   :  { %v1954_v43 = vpop.f32.mrb[51].mxu1 }
 0x37d   :  { %v1062_v51 = vmul.f32 %v3513_v8, %v1952_v2  ;;  %v1955_v26 = vadd.f32 %v1954_v43, %v1953_v58  ;;  %v1157_v48 = vmax.f32 %v1125_v41, 0.0  ;;  %v2164_v8 = vld [vmem:[%s3420_s6 + $0x30] sm:$0xff]  }
 0x37e   :  { %2082 = vmatprep.subr.bf16.mxu1 %v2164_v8 }
 0x37f   :  { %v1094_v13 = vmul.f32 %v3181_v38, %v1062_v51  ;;  %v1063_v34 = vmul.f32 %v3514_v18, %v1955_v26  ;;  %v1177_v56 = vpack.c.bf16 %v1157_v48, %v1156_v59  ;;  %2083 = vmatpush3.bf16.msra.mxu1 %v2164_v8  ;;  %v3248_v51 = vld [vmem:[%s3421_s5] ss:$0 sm:$0xff] }
 0x380   :  { %2084 = vmatprep.subr.bf16.mxu1 %v2165_v24 }
 0x381   :  { %v1095_v49 = vmul.f32 %v3181_v38, %v1063_v34  ;;  %v1956_v61 = vpop.f32.mrb[52].mxu1  ;;  %2059 = vmatmul.mubr.bf16.gmra.mrb[84].mxu0 %v1177_v56  ;;  %v1126_v63 = vadd.f32 %v3187_v3, %v1094_v13 }
 0x382   :  { %v1957_v20 = vpop.f32.mrb[53].mxu1 }
 0x383   :  { %v1958_v28 = vadd.f32 %v1957_v20, %v1956_v61  ;;  %v1959_v62 = vpop.f32.mrb[54].mxu1  ;;  %v1127_v47 = vadd.f32 %v3187_v3, %v1095_v49  ;;  %v1158_v46 = vmax.f32 %v1126_v63, 0.0  ;;  %2085 = vmatpush3.bf16.msra.mxu1 %v2165_v24 }
 0x384   :  { %v1960_v5 = vpop.f32.mrb[55].mxu1 }
 0x385   :  { %v1064_v6 = vmul.f32 %v3516_v4, %v1958_v28  ;;  %v1961_v18 = vadd.f32 %v1960_v5, %v1959_v62  ;;  %v1159_v9 = vmax.f32 %v1127_v47, 0.0 }
 0x387   :  { %v1096_v15 = vmul.f32 %v3181_v38, %v1064_v6  ;;  %v1065_v40 = vmul.f32 %v3517_v60, %v1961_v18  ;;  %v1178_v31 = vpack.c.bf16 %v1159_v9, %v1158_v46 }
 0x389   :  { %v1097_v57 = vmul.f32 %v3181_v38, %v1065_v40  ;;  %v1962_v44 = vpop.f32.mrb[56].mxu1  ;;  %2062 = vmatprep.mubr.bf16.mxu0 %v1178_v31  ;;  %v1128_v4 = vadd.f32 %v3187_v3, %v1096_v15 }
 0x38a   :  { %v1963_v14 = vpop.f32.mrb[57].mxu1 }
 0x38b   :  { %v1964_v30 = vadd.f32 %v1963_v14, %v1962_v44  ;;  %v1965_v27 = vpop.f32.mrb[58].mxu1  ;;  %v1129_v29 = vadd.f32 %v3187_v3, %v1097_v57  ;;  %v1160_v37 = vmax.f32 %v1128_v4, 0.0 }
 0x38c   :  { %v1966_v50 = vpop.f32.mrb[59].mxu1 }
 0x38d   :  { %v1066_v60 = vmul.f32 %v3519_v10, %v1964_v30  ;;  %v1967_v36 = vadd.f32 %v1966_v50, %v1965_v27  ;;  %v1161_v1 = vmax.f32 %v1129_v29, 0.0 }
 0x38f   :  { %v1098_v7 = vmul.f32 %v3181_v38, %v1066_v60  ;;  %v1067_v22 = vmul.f32 %v3520_v21, %v1967_v36  ;;  %v1179_v23 = vpack.c.bf16 %v1161_v1, %v1160_v37 }
 0x391   :  { %v1099_v39 = vmul.f32 %v3181_v38, %v1067_v22  ;;  %v1968_v54 = vpop.f32.mrb[60].mxu1  ;;  %2063 = vmatmul.mubr.bf16.gmra.mrb[88].mxu0 %v1179_v23  ;;  %v1130_v55 = vadd.f32 %v3187_v3, %v1098_v7 }
 0x392   :  { %v1969_v45 = vpop.f32.mrb[61].mxu1 }
 0x393   :  { %v1970_v42 = vadd.f32 %v1969_v45, %v1968_v54  ;;  %v1971_v11 = vpop.f32.mrb[62].mxu1  ;;  %v1131_v12 = vadd.f32 %v3187_v3, %v1099_v39  ;;  %v1162_v33 = vmax.f32 %v1130_v55, 0.0 }
 0x394   :  { %v1972_v10 = vpop.f32.mrb[63].mxu1 }
 0x395   :  { %v1068_v32 = vmul.f32 %v2677_v25, %v1970_v42  ;;  %v1973_v19 = vadd.f32 %v1972_v10, %v1971_v11  ;;  %v1163_v52 = vmax.f32 %v1131_v12, 0.0 }
 0x397   :  { %v1100_v21 = vmul.f32 %v3181_v38, %v1068_v32  ;;  %v1069_v53 = vmul.f32 %v2679_v35, %v1973_v19  ;;  %v1180_v16 = vpack.c.bf16 %v1163_v52, %v1162_v33 }
 0x399   :  { %v1101_v17 = vmul.f32 %v3181_v38, %v1069_v53  ;;  %2066 = vmatprep.mubr.bf16.mxu0 %v1180_v16  ;;  %v1132_v0 = vadd.f32 %v3187_v3, %v1100_v21 }
 0x39b   :  { %v1133_v2 = vadd.f32 %v3187_v3, %v1101_v17  ;;  %v1164_v58 = vmax.f32 %v1132_v0, 0.0 }
 0x39d   :  { %v1165_v41 = vmax.f32 %v1133_v2, 0.0 }
 0x39f   :  { %v1181_v43 = vpack.c.bf16 %v1165_v41, %v1164_v58 }
 0x3a1   :  { %2067 = vmatmul.mubr.bf16.gmra.mrb[92].mxu0 %v1181_v43 }
 0x404   :  { %v2040_v25 = vpop.f32.mrb[64].mxu0 }
 0x405   :  { %v1287_v26 = vpop.f32.mrb[65].mxu0  ;;  %v1296_v59 = vadd.f32 %v2040_v25, %v3248_v51 }
 0x406   :  { %v2041_v35 = vpop.f32.mrb[66].mxu0  ;;  %v1288_v13 = vadd.f32 %v3248_v51, %v1287_v26 }
 0x407   :  { %v1299_v38 = vadd.f32 %v2041_v35, %v3248_v51  ;;  %v1290_v48 = vpop.f32.mrb[67].mxu0 }
 0x408   :  { %v1291_v3 = vadd.f32 %v3248_v51, %v1290_v48 }
 0x409   :  { %v1415_v34 = vpack.c.bf16 %v1299_v38, %v1296_v59 }
 0x40a   :  { %v1414_v56 = vpack.c.bf16 %v1291_v3, %v1288_v13 }
 0x40c   :  { %2086 = vmatprep.mubr.bf16.mxu1 %v1414_v56 }
 0x40d   :  { %2087 = vmatmul.mubr.bf16.vlgmr.msra.gmra.mrb[64].mxu1 %v1415_v34 }
 0x414   :  { %v2044_v49 = vpop.f32.mrb[68].mxu0 }
 0x415   :  { %v1303_v61 = vpop.f32.mrb[69].mxu0  ;;  %v1312_v20 = vadd.f32 %v2044_v49, %v3248_v51 }
 0x416   :  { %v2045_v63 = vpop.f32.mrb[70].mxu0  ;;  %v1304_v47 = vadd.f32 %v3248_v51, %v1303_v61 }
 0x417   :  { %v1315_v28 = vadd.f32 %v2045_v63, %v3248_v51  ;;  %v1306_v62 = vpop.f32.mrb[71].mxu0 }
 0x418   :  { %v1307_v8 = vadd.f32 %v3248_v51, %v1306_v62 }
 0x419   :  { %v1417_v5 = vpack.c.bf16 %v1315_v28, %v1312_v20 }
 0x41a   :  { %v1416_v6 = vpack.c.bf16 %v1307_v8, %v1304_v47  ;;  %v3285_v8 = vld [vmem:[%s3422_s7] ss:$0 sm:$0xff] }
 0x41c   :  { %2090 = vmatprep.mubr.bf16.mxu1 %v1416_v6 }
 0x41d   :  { %2091 = vmatmul.mubr.bf16.gmra.mrb[68].mxu1 %v1417_v5 }
 0x424   :  { %v2048_v18 = vpop.f32.mrb[72].mxu0 }
 0x425   :  { %v1319_v46 = vpop.f32.mrb[73].mxu0  ;;  %v1328_v15 = vadd.f32 %v2048_v18, %v3248_v51 }
 0x426   :  { %v2049_v9 = vpop.f32.mrb[74].mxu0  ;;  %v1320_v24 = vadd.f32 %v3248_v51, %v1319_v46 }
 0x427   :  { %v1331_v40 = vadd.f32 %v2049_v9, %v3248_v51  ;;  %v1322_v31 = vpop.f32.mrb[75].mxu0 }
 0x428   :  { %v1323_v57 = vadd.f32 %v3248_v51, %v1322_v31 }
 0x429   :  { %v1419_v44 = vpack.c.bf16 %v1331_v40, %v1328_v15 }
 0x42a   :  { %v1418_v4 = vpack.c.bf16 %v1323_v57, %v1320_v24 }
 0x42c   :  { %2094 = vmatprep.mubr.bf16.mxu1 %v1418_v4 }
 0x42d   :  { %2095 = vmatmul.mubr.bf16.gmra.mrb[72].mxu1 %v1419_v44 }
 0x434   :  { %v2052_v14 = vpop.f32.mrb[76].mxu0 }
 0x435   :  { %v1335_v30 = vpop.f32.mrb[77].mxu0  ;;  %v1344_v29 = vadd.f32 %v2052_v14, %v3248_v51 }
 0x436   :  { %v2053_v27 = vpop.f32.mrb[78].mxu0  ;;  %v1336_v36 = vadd.f32 %v3248_v51, %v1335_v30 }
 0x437   :  { %v1347_v50 = vadd.f32 %v2053_v27, %v3248_v51  ;;  %v1338_v60 = vpop.f32.mrb[79].mxu0 }
 0x438   :  { %v1339_v37 = vadd.f32 %v3248_v51, %v1338_v60 }
 0x439   :  { %v1421_v1 = vpack.c.bf16 %v1347_v50, %v1344_v29 }
 0x43a   :  { %v1420_v7 = vpack.c.bf16 %v1339_v37, %v1336_v36 }
 0x43c   :  { %2098 = vmatprep.mubr.bf16.mxu1 %v1420_v7 }
 0x43d   :  { %2099 = vmatmul.mubr.bf16.gmra.mrb[76].mxu1 %v1421_v1 }
 0x444   :  { %v2056_v22 = vpop.f32.mrb[80].mxu0 }
 0x445   :  { %v1351_v23 = vpop.f32.mrb[81].mxu0  ;;  %v1360_v54 = vadd.f32 %v2056_v22, %v3248_v51 }
 0x446   :  { %v2057_v39 = vpop.f32.mrb[82].mxu0  ;;  %v1352_v42 = vadd.f32 %v3248_v51, %v1351_v23 }
 0x447   :  { %v1363_v55 = vadd.f32 %v2057_v39, %v3248_v51  ;;  %v1354_v45 = vpop.f32.mrb[83].mxu0 }
 0x448   :  { %v1355_v11 = vadd.f32 %v3248_v51, %v1354_v45 }
 0x449   :  { %v1423_v12 = vpack.c.bf16 %v1363_v55, %v1360_v54 }
 0x44a   :  { %v1422_v10 = vpack.c.bf16 %v1355_v11, %v1352_v42 }
 0x44c   :  { %2102 = vmatprep.mubr.bf16.mxu1 %v1422_v10 }
 0x44d   :  { %2103 = vmatmul.mubr.bf16.gmra.mrb[80].mxu1 %v1423_v12 }
 0x454   :  { %v2060_v32 = vpop.f32.mrb[84].mxu0 }
 0x455   :  { %v1367_v19 = vpop.f32.mrb[85].mxu0  ;;  %v1376_v52 = vadd.f32 %v2060_v32, %v3248_v51 }
 0x456   :  { %v2061_v33 = vpop.f32.mrb[86].mxu0  ;;  %v1368_v16 = vadd.f32 %v3248_v51, %v1367_v19 }
 0x457   :  { %v1379_v21 = vadd.f32 %v2061_v33, %v3248_v51  ;;  %v1370_v53 = vpop.f32.mrb[87].mxu0 }
 0x458   :  { %v1371_v17 = vadd.f32 %v3248_v51, %v1370_v53 }
 0x459   :  { %v1425_v0 = vpack.c.bf16 %v1379_v21, %v1376_v52 }
 0x45a   :  { %v1424_v2 = vpack.c.bf16 %v1371_v17, %v1368_v16 }
 0x45c   :  { %2106 = vmatprep.mubr.bf16.mxu1 %v1424_v2 }
 0x45d   :  { %2107 = vmatmul.mubr.bf16.gmra.mrb[84].mxu1 %v1425_v0 }
 0x464   :  { %v2064_v58 = vpop.f32.mrb[88].mxu0 }
 0x465   :  { %v1383_v41 = vpop.f32.mrb[89].mxu0  ;;  %v1392_v25 = vadd.f32 %v2064_v58, %v3248_v51 }
 0x466   :  { %v2065_v43 = vpop.f32.mrb[90].mxu0  ;;  %v1384_v59 = vadd.f32 %v3248_v51, %v1383_v41 }
 0x467   :  { %v1395_v26 = vadd.f32 %v2065_v43, %v3248_v51  ;;  %v1386_v35 = vpop.f32.mrb[91].mxu0 }
 0x468   :  { %v1387_v38 = vadd.f32 %v3248_v51, %v1386_v35 }
 0x469   :  { %v1427_v48 = vpack.c.bf16 %v1395_v26, %v1392_v25 }
 0x46a   :  { %v1426_v13 = vpack.c.bf16 %v1387_v38, %v1384_v59 }
 0x46c   :  { %2110 = vmatprep.mubr.bf16.mxu1 %v1426_v13 }
 0x46d   :  { %2111 = vmatmul.mubr.bf16.gmra.mrb[88].mxu1 %v1427_v48 }
 0x474   :  { %v2068_v3 = vpop.f32.mrb[92].mxu0 }
 0x475   :  { %v1399_v34 = vpop.f32.mrb[93].mxu0  ;;  %v1408_v49 = vadd.f32 %v2068_v3, %v3248_v51 }
 0x476   :  { %v2069_v56 = vpop.f32.mrb[94].mxu0  ;;  %v1400_v20 = vadd.f32 %v3248_v51, %v1399_v34 }
 0x477   :  { %v1411_v61 = vadd.f32 %v2069_v56, %v3248_v51  ;;  %v1402_v63 = vpop.f32.mrb[95].mxu0 }
 0x478   :  { %v1403_v28 = vadd.f32 %v3248_v51, %v1402_v63 }
 0x479   :  { %v1429_v62 = vpack.c.bf16 %v1411_v61, %v1408_v49 }
 0x47a   :  { %v1428_v47 = vpack.c.bf16 %v1403_v28, %v1400_v20 }
 0x47c   :  { %2114 = vmatprep.mubr.bf16.mxu1 %v1428_v47 }
 0x47d   :  { %2115 = vmatmul.mubr.bf16.gmra.mrb[92].mxu1 %v1429_v62 }
 0x4e0   :  { %v2088_v5 = vpop.f32.mrb[64].mxu1 }
 0x4e1   :  { %v1544_v6 = vadd.f32 %v2088_v5, %v3285_v8  ;;  %v1535_v18 = vpop.f32.mrb[65].mxu1 }
 0x4e2   :  { %v1536_v46 = vadd.f32 %v3285_v8, %v1535_v18  ;;  %v2089_v9 = vpop.f32.mrb[66].mxu1 }
 0x4e3   :  { %1664 = vst [vmem:[%s3423_s8 + $0x10] sm:$0xff] %v1544_v6  ;;  %v1547_v51 = vadd.f32 %v2089_v9, %v3285_v8  ;;  %v1538_v15 = vpop.f32.mrb[67].mxu1 }
 0x4e4   :  { %1662 = vst [vmem:[%s3423_s8] sm:$0xff] %v1536_v46  ;;  %v1539_v40 = vadd.f32 %v3285_v8, %v1538_v15 }
 0x4e5   :  { %1665 = vst [vmem:[%s3423_s8 + $0x18] sm:$0xff] %v1547_v51 }
 0x4e6   :  { %1663 = vst [vmem:[%s3423_s8 + $0x8] sm:$0xff] %v1539_v40 }
 0x4f0   :  { %v2092_v31 = vpop.f32.mrb[68].mxu1 }
 0x4f1   :  { %v1560_v24 = vadd.f32 %v2092_v31, %v3285_v8  ;;  %v1551_v57 = vpop.f32.mrb[69].mxu1 }
 0x4f2   :  { %v1552_v44 = vadd.f32 %v3285_v8, %v1551_v57  ;;  %v2093_v4 = vpop.f32.mrb[70].mxu1 }
 0x4f3   :  { %1668 = vst [vmem:[%s3423_s8 + $0x30] sm:$0xff] %v1560_v24  ;;  %v1563_v14 = vadd.f32 %v2093_v4, %v3285_v8  ;;  %v1554_v30 = vpop.f32.mrb[71].mxu1 }
 0x4f4   :  { %1666 = vst [vmem:[%s3423_s8 + $0x20] sm:$0xff] %v1552_v44  ;;  %v1555_v27 = vadd.f32 %v3285_v8, %v1554_v30 }
 0x4f5   :  { %1669 = vst [vmem:[%s3423_s8 + $0x38] sm:$0xff] %v1563_v14 }
 0x4f6   :  { %1667 = vst [vmem:[%s3423_s8 + $0x28] sm:$0xff] %v1555_v27 }
 0x500   :  { %v2096_v29 = vpop.f32.mrb[72].mxu1 }
 0x501   :  { %v1576_v50 = vadd.f32 %v2096_v29, %v3285_v8  ;;  %v1567_v60 = vpop.f32.mrb[73].mxu1 }
 0x502   :  { %v1568_v36 = vadd.f32 %v3285_v8, %v1567_v60  ;;  %v2097_v37 = vpop.f32.mrb[74].mxu1 }
 0x503   :  { %1672 = vst [vmem:[%s3423_s8 + $0x50] sm:$0xff] %v1576_v50  ;;  %v1579_v1 = vadd.f32 %v2097_v37, %v3285_v8  ;;  %v1570_v7 = vpop.f32.mrb[75].mxu1 }
 0x504   :  { %1670 = vst [vmem:[%s3423_s8 + $0x40] sm:$0xff] %v1568_v36  ;;  %v1571_v22 = vadd.f32 %v3285_v8, %v1570_v7 }
 0x505   :  { %1673 = vst [vmem:[%s3423_s8 + $0x58] sm:$0xff] %v1579_v1 }
 0x506   :  { %1671 = vst [vmem:[%s3423_s8 + $0x48] sm:$0xff] %v1571_v22 }
 0x510   :  { %v2100_v23 = vpop.f32.mrb[76].mxu1 }
 0x511   :  { %v1592_v39 = vadd.f32 %v2100_v23, %v3285_v8  ;;  %v1583_v54 = vpop.f32.mrb[77].mxu1 }
 0x512   :  { %v1584_v55 = vadd.f32 %v3285_v8, %v1583_v54  ;;  %v2101_v45 = vpop.f32.mrb[78].mxu1 }
 0x513   :  { %1676 = vst [vmem:[%s3423_s8 + $0x70] sm:$0xff] %v1592_v39  ;;  %v1595_v42 = vadd.f32 %v2101_v45, %v3285_v8  ;;  %v1586_v11 = vpop.f32.mrb[79].mxu1 }
 0x514   :  { %1674 = vst [vmem:[%s3423_s8 + $0x60] sm:$0xff] %v1584_v55  ;;  %v1587_v12 = vadd.f32 %v3285_v8, %v1586_v11 }
 0x515   :  { %1677 = vst [vmem:[%s3423_s8 + $0x78] sm:$0xff] %v1595_v42 }
 0x516   :  { %1675 = vst [vmem:[%s3423_s8 + $0x68] sm:$0xff] %v1587_v12 }
 0x520   :  { %v2104_v10 = vpop.f32.mrb[80].mxu1 }
 0x521   :  { %v1608_v32 = vadd.f32 %v2104_v10, %v3285_v8  ;;  %v1599_v19 = vpop.f32.mrb[81].mxu1 }
 0x522   :  { %v1600_v33 = vadd.f32 %v3285_v8, %v1599_v19  ;;  %v2105_v52 = vpop.f32.mrb[82].mxu1 }
 0x523   :  { %1680 = vst [vmem:[%s3423_s8 + $0x90] sm:$0xff] %v1608_v32  ;;  %v1611_v21 = vadd.f32 %v2105_v52, %v3285_v8  ;;  %v1602_v53 = vpop.f32.mrb[83].mxu1 }
 0x524   :  { %1678 = vst [vmem:[%s3423_s8 + $0x80] sm:$0xff] %v1600_v33  ;;  %v1603_v16 = vadd.f32 %v3285_v8, %v1602_v53 }
 0x525   :  { %1681 = vst [vmem:[%s3423_s8 + $0x98] sm:$0xff] %v1611_v21 }
 0x526   :  { %1679 = vst [vmem:[%s3423_s8 + $0x88] sm:$0xff] %v1603_v16 }
 0x530   :  { %v2108_v17 = vpop.f32.mrb[84].mxu1 }
 0x531   :  { %v1624_v0 = vadd.f32 %v2108_v17, %v3285_v8  ;;  %v1615_v2 = vpop.f32.mrb[85].mxu1 }
 0x532   :  { %v1616_v58 = vadd.f32 %v3285_v8, %v1615_v2  ;;  %v2109_v41 = vpop.f32.mrb[86].mxu1 }
 0x533   :  { %1684 = vst [vmem:[%s3423_s8 + $0xb0] sm:$0xff] %v1624_v0  ;;  %v1627_v43 = vadd.f32 %v2109_v41, %v3285_v8  ;;  %v1618_v25 = vpop.f32.mrb[87].mxu1 }
 0x534   :  { %1682 = vst [vmem:[%s3423_s8 + $0xa0] sm:$0xff] %v1616_v58  ;;  %v1619_v26 = vadd.f32 %v3285_v8, %v1618_v25 }
 0x535   :  { %1685 = vst [vmem:[%s3423_s8 + $0xb8] sm:$0xff] %v1627_v43 }
 0x536   :  { %1683 = vst [vmem:[%s3423_s8 + $0xa8] sm:$0xff] %v1619_v26 }
 0x540   :  { %v2112_v35 = vpop.f32.mrb[88].mxu1 }
 0x541   :  { %v1640_v59 = vadd.f32 %v2112_v35, %v3285_v8  ;;  %v1631_v38 = vpop.f32.mrb[89].mxu1 }
 0x542   :  { %v1632_v48 = vadd.f32 %v3285_v8, %v1631_v38  ;;  %v2113_v13 = vpop.f32.mrb[90].mxu1 }
 0x543   :  { %1688 = vst [vmem:[%s3423_s8 + $0xd0] sm:$0xff] %v1640_v59  ;;  %v1643_v3 = vadd.f32 %v2113_v13, %v3285_v8  ;;  %v1634_v34 = vpop.f32.mrb[91].mxu1 }
 0x544   :  { %1686 = vst [vmem:[%s3423_s8 + $0xc0] sm:$0xff] %v1632_v48  ;;  %v1635_v56 = vadd.f32 %v3285_v8, %v1634_v34 }
 0x545   :  { %1689 = vst [vmem:[%s3423_s8 + $0xd8] sm:$0xff] %v1643_v3 }
 0x546   :  { %1687 = vst [vmem:[%s3423_s8 + $0xc8] sm:$0xff] %v1635_v56 }
 0x550   :  { %v2116_v49 = vpop.f32.mrb[92].mxu1 }
 0x551   :  { %v1656_v61 = vadd.f32 %v2116_v49, %v3285_v8  ;;  %v1647_v63 = vpop.f32.mrb[93].mxu1 }
 0x552   :  { %v1648_v20 = vadd.f32 %v3285_v8, %v1647_v63  ;;  %v2117_v28 = vpop.f32.mrb[94].mxu1 }
 0x553   :  { %1692 = vst [vmem:[%s3423_s8 + $0xf0] sm:$0xff] %v1656_v61  ;;  %v1659_v62 = vadd.f32 %v2117_v28, %v3285_v8  ;;  %v1650_v47 = vpop.f32.mrb[95].mxu1 }
 0x554   :  { %1690 = vst [vmem:[%s3423_s8 + $0xe0] sm:$0xff] %v1648_v20  ;;  %v1651_v5 = vadd.f32 %v3285_v8, %v1650_v47 }
 0x555   :  { %1693 = vst [vmem:[%s3423_s8 + $0xf8] sm:$0xff] %v1659_v62 }
 0x556   :  { %1691 = vst [vmem:[%s3423_s8 + $0xe8] sm:$0xff] %v1651_v5 }

</bundles_post_ra>
